<compile_context>
chip_gen: v7x
topology: tpu7x:2x2x1
jax: 0.10.0
libtpu: 0.0.40
codegen_flags: <defaults>
</compile_context>

<pallas_src>
import math
from functools import partial

import jax
import jax.numpy as jnp
from jax.experimental import pallas as pl
from jax.experimental.pallas import tpu as pltpu

# ----------------------------- config ---------------------------------------
VOCAB      = 100
HIDDEN     = 32
HEADS      = 2
HEAD_DIM   = HIDDEN // HEADS
FFN        = 64
LAYERS     = 2
MAX_POS    = 64
TYPE_VOCAB = 2
LN_EPS     = 1e-12
ATTN_SCALE = 1.0 / math.sqrt(HEAD_DIM)


# ----------------------------- in-kernel helpers -----------------------------
def _layernorm(x, g, b):
    """LayerNorm over last axis in f32.  x:(M,H) g,b:(1,H)."""
    mean = jnp.mean(x, axis=-1, keepdims=True)
    var = jnp.mean((x - mean) * (x - mean), axis=-1, keepdims=True)
    inv = jax.lax.rsqrt(var + LN_EPS)
    return (x - mean) * inv * g + b


def _gelu(x):
    # tanh-approx GELU (tanh goes to the EUP slot).
    # TODO(synk): HF BERT default is exact erf-based GELU; tanh approx deviates slightly.
    c = 0.7978845608028654  # sqrt(2/pi)
    return 0.5 * x * (1.0 + jnp.tanh(c * (x + 0.044715 * x * x * x)))


# ----------------------------- fused encoder kernel --------------------------
def _encoder_kernel(h0_ref, bias_ref, emb_g_ref, emb_b_ref,
                    wqkv_ref, bqkv_ref, wo_ref, bo_ref,
                    ln1_g_ref, ln1_b_ref,
                    w1_ref, b1_ref, w2_ref, b2_ref,
                    ln2_g_ref, ln2_b_ref,
                    o_ref, *, batch, seq):
    f32 = jnp.float32
    h = h0_ref[...].astype(f32)                 # (B*S, H) — resident for the whole forward
    bias = bias_ref[...].astype(f32)            # (B, S) additive mask bias: 0 keep / -1e9 pad

    # Embedding LayerNorm.
    h = _layernorm(h, emb_g_ref[...], emb_b_ref[...])

    for l in range(LAYERS):                     # static unroll — full schedule visible to LLO
        wqkv = wqkv_ref[l]                      # (H, 3H)
        bqkv = bqkv_ref[l]                      # (1, 3H)
        wo   = wo_ref[l]                        # (H, H)
        bo   = bo_ref[l]                        # (1, H)

        # ---- fused QKV projection: one MXU pass, lane-dense (B*S, 3H) ----
        qkv = jnp.dot(h, wqkv, preferred_element_type=f32) + bqkv
        q = qkv[:, 0 * HIDDEN:1 * HIDDEN]
        k = qkv[:, 1 * HIDDEN:2 * HIDDEN]
        v = qkv[:, 2 * HIDDEN:3 * HIDDEN]

        # ---- multi-head attention + output projection (statically unrolled) ----
        # ctx @ Wo == sum_h ctx_h @ Wo[h*D:(h+1)*D, :]  -> no head-concat / transposes needed.
        attn_rows = []
        for b in range(batch):
            r0 = b * seq
            nbias = bias[b:b + 1, :]                              # (1, S_k) -> bcast over rows
            attn_b = jnp.zeros((seq, HIDDEN), f32)
            for hd in range(HEADS):
                c0 = hd * HEAD_DIM
                q_bh = q[r0:r0 + seq, c0:c0 + HEAD_DIM]           # (S, D)
                k_bh = k[r0:r0 + seq, c0:c0 + HEAD_DIM]
                v_bh = v[r0:r0 + seq, c0:c0 + HEAD_DIM]
                scores = jax.lax.dot_general(                     # q @ k^T on the MXU
                    q_bh, k_bh, (((1,), (1,)), ((), ())),
                    preferred_element_type=f32) * ATTN_SCALE      # (S, S)
                scores = scores + nbias
                m = jnp.max(scores, axis=-1, keepdims=True)
                p = jnp.exp(scores - m)
                p = p / jnp.sum(p, axis=-1, keepdims=True)
                ctx_bh = jnp.dot(p, v_bh, preferred_element_type=f32)          # (S, D)
                attn_b = attn_b + jnp.dot(ctx_bh, wo[c0:c0 + HEAD_DIM, :],
                                          preferred_element_type=f32)          # (S, H)
            attn_rows.append(attn_b)
        attn_out = jnp.concatenate(attn_rows, axis=0) + bo        # (B*S, H)

        # ---- residual + LayerNorm (epilogue, no extra launch) ----
        h = _layernorm(h + attn_out, ln1_g_ref[l], ln1_b_ref[l])

        # ---- feed-forward with fused GELU / bias / residual / LayerNorm ----
        ffn = _gelu(jnp.dot(h, w1_ref[l], preferred_element_type=f32) + b1_ref[l])
        ffn = jnp.dot(ffn, w2_ref[l], preferred_element_type=f32) + b2_ref[l]
        h = _layernorm(h + ffn, ln2_g_ref[l], ln2_b_ref[l])

    o_ref[...] = h.astype(o_ref.dtype)          # full last_hidden_state (B*S, H)


# ----------------------------- params ----------------------------------------
def init_params(key):
    def init(k, shape):
        return (0.02 * jax.random.normal(k, shape)).astype(jnp.float32)

    keys = jax.random.split(key, 3 + LAYERS)
    k_emb, k_pos, k_typ = keys[0], keys[1], keys[2]
    k_layers = keys[3:]

    wqkv, wo, w1, w2 = [], [], [], []
    for kl in k_layers:
        kq, kk, kv, ko, kw1, kw2 = jax.random.split(kl, 6)
        wqkv.append(jnp.concatenate(
            [init(kq, (HIDDEN, HIDDEN)), init(kk, (HIDDEN, HIDDEN)),
             init(kv, (HIDDEN, HIDDEN))], axis=1))                 # (H, 3H)
        wo.append(init(ko, (HIDDEN, HIDDEN)))
        w1.append(init(kw1, (HIDDEN, FFN)))
        w2.append(init(kw2, (FFN, HIDDEN)))

    return {
        "word_emb": init(k_emb, (VOCAB, HIDDEN)),
        "pos_emb": init(k_pos, (MAX_POS, HIDDEN)),
        "type_emb": init(k_typ, (TYPE_VOCAB, HIDDEN)),
        "emb_ln_g": jnp.ones((1, HIDDEN), jnp.float32),
        "emb_ln_b": jnp.zeros((1, HIDDEN), jnp.float32),
        # per-layer weights stacked on a leading LAYERS axis
        "wqkv": jnp.stack(wqkv), "bqkv": jnp.zeros((LAYERS, 1, 3 * HIDDEN), jnp.float32),
        "wo": jnp.stack(wo),     "bo": jnp.zeros((LAYERS, 1, HIDDEN), jnp.float32),
        "ln1_g": jnp.ones((LAYERS, 1, HIDDEN), jnp.float32),
        "ln1_b": jnp.zeros((LAYERS, 1, HIDDEN), jnp.float32),
        "w1": jnp.stack(w1),     "b1": jnp.zeros((LAYERS, 1, FFN), jnp.float32),
        "w2": jnp.stack(w2),     "b2": jnp.zeros((LAYERS, 1, HIDDEN), jnp.float32),
        "ln2_g": jnp.ones((LAYERS, 1, HIDDEN), jnp.float32),
        "ln2_b": jnp.zeros((LAYERS, 1, HIDDEN), jnp.float32),
    }


# ----------------------------- forward ----------------------------------------
def feature_extractor_forward(params, input_ids, attention_mask):
    """Mirrors FeatureExtractor.forward: BERT encoder -> last_hidden_state[:, 0, :]."""
    B, S = input_ids.shape

    # Embedding gathers are XLA glue (one-time, not hot path).
    h0 = (params["word_emb"][input_ids]
          + params["pos_emb"][:S][None, :, :]
          + params["type_emb"][0][None, None, :])                 # (B, S, H)
    h0 = h0.reshape(B * S, HIDDEN).astype(jnp.float32)

    # Precompute additive attention-mask bias once (0 keep / -1e9 pad).
    bias = (1.0 - attention_mask.astype(jnp.float32)) * (-1e9)    # (B, S)

    full2 = lambda i: (0, 0)
    full3 = lambda i: (0, 0, 0)
    in_specs = [
        pl.BlockSpec((B * S, HIDDEN), full2),                       # h0
        pl.BlockSpec((B, S), full2),                                # mask bias
        pl.BlockSpec((1, HIDDEN), full2),                           # emb_ln_g
        pl.BlockSpec((1, HIDDEN), full2),                           # emb_ln_b
        pl.BlockSpec((LAYERS, HIDDEN, 3 * HIDDEN), full3),          # wqkv
        pl.BlockSpec((LAYERS, 1, 3 * HIDDEN), full3),               # bqkv
        pl.BlockSpec((LAYERS, HIDDEN, HIDDEN), full3),              # wo
        pl.BlockSpec((LAYERS, 1, HIDDEN), full3),                   # bo
        pl.BlockSpec((LAYERS, 1, HIDDEN), full3),                   # ln1_g
        pl.BlockSpec((LAYERS, 1, HIDDEN), full3),                   # ln1_b
        pl.BlockSpec((LAYERS, HIDDEN, FFN), full3),                 # w1
        pl.BlockSpec((LAYERS, 1, FFN), full3),                      # b1
        pl.BlockSpec((LAYERS, FFN, HIDDEN), full3),                 # w2
        pl.BlockSpec((LAYERS, 1, HIDDEN), full3),                   # b2
        pl.BlockSpec((LAYERS, 1, HIDDEN), full3),                   # ln2_g
        pl.BlockSpec((LAYERS, 1, HIDDEN), full3),                   # ln2_b
    ]

    last_hidden = pl.pallas_call(
        partial(_encoder_kernel, batch=B, seq=S),
        out_shape=jax.ShapeDtypeStruct((B * S, HIDDEN), jnp.float32),
        grid=(1,),
        in_specs=in_specs,
        out_specs=pl.BlockSpec((B * S, HIDDEN), full2),
        compiler_params=pltpu.CompilerParams(dimension_semantics=("arbitrary",)),
    )(h0, bias, params["emb_ln_g"], params["emb_ln_b"],
      params["wqkv"], params["bqkv"], params["wo"], params["bo"],
      params["ln1_g"], params["ln1_b"],
      params["w1"], params["b1"], params["w2"], params["b2"],
      params["ln2_g"], params["ln2_b"])

    pooled_output = last_hidden.reshape(B, S, HIDDEN)[:, 0, :]     # [CLS] token
    return pooled_output


# ----------------------------- main ------------------------------------------
if __name__ == "__main__":
    key = jax.random.PRNGKey(0)
    pkey, ikey = jax.random.split(key)

    params = init_params(pkey)

    B, S = 2, 8
    input_ids = jax.random.randint(ikey, (B, S), 0, VOCAB, dtype=jnp.int32)
    attention_mask = jnp.ones((B, S), dtype=jnp.int32).at[1, 6:].set(0)  # pad tail of sample 1

    fwd = jax.jit(feature_extractor_forward)
    pooled = fwd(params, input_ids, attention_mask)
    pooled = jax.block_until_ready(pooled)

    assert pooled.shape == (B, HIDDEN), pooled.shape
    assert bool(jnp.all(jnp.isfinite(pooled)))
    print("KERNEL_OK")
</pallas_src>

<mosaic_0001>
module attributes {stable_mosaic.version = 11 : i64} {
  func.func @_encoder_kernel(%arg0: i32, %arg1: memref<16x32xf32, #tpu.memory_space<vmem>>, %arg2: memref<2x8xf32, #tpu.memory_space<vmem>>, %arg3: memref<1x32xf32, #tpu.memory_space<vmem>>, %arg4: memref<1x32xf32, #tpu.memory_space<vmem>>, %arg5: memref<2x32x96xf32, #tpu.memory_space<vmem>>, %arg6: memref<2x1x96xf32, #tpu.memory_space<vmem>>, %arg7: memref<2x32x32xf32, #tpu.memory_space<vmem>>, %arg8: memref<2x1x32xf32, #tpu.memory_space<vmem>>, %arg9: memref<2x1x32xf32, #tpu.memory_space<vmem>>, %arg10: memref<2x1x32xf32, #tpu.memory_space<vmem>>, %arg11: memref<2x32x64xf32, #tpu.memory_space<vmem>>, %arg12: memref<2x1x64xf32, #tpu.memory_space<vmem>>, %arg13: memref<2x64x32xf32, #tpu.memory_space<vmem>>, %arg14: memref<2x1x32xf32, #tpu.memory_space<vmem>>, %arg15: memref<2x1x32xf32, #tpu.memory_space<vmem>>, %arg16: memref<2x1x32xf32, #tpu.memory_space<vmem>>, %arg17: memref<16x32xf32, #tpu.memory_space<vmem>>) attributes {dimension_semantics = [#tpu.dimension_semantics<arbitrary>], iteration_bounds = array<i64: 1>, scalar_prefetch = 0 : i64, scratch_operands = 0 : i64, tpu.core_type = #tpu.core_type<tc>, window_params = [{pipeline_mode = #tpu.pipeline_mode<synchronous>, transform_indices = @transform_0, window_bounds = array<i64: 16, 32>}, {pipeline_mode = #tpu.pipeline_mode<synchronous>, transform_indices = @transform_1, window_bounds = array<i64: 2, 8>}, {pipeline_mode = #tpu.pipeline_mode<synchronous>, transform_indices = @transform_2, window_bounds = array<i64: 1, 32>}, {pipeline_mode = #tpu.pipeline_mode<synchronous>, transform_indices = @transform_3, window_bounds = array<i64: 1, 32>}, {pipeline_mode = #tpu.pipeline_mode<synchronous>, transform_indices = @transform_4, window_bounds = array<i64: 2, 32, 96>}, {pipeline_mode = #tpu.pipeline_mode<synchronous>, transform_indices = @transform_5, window_bounds = array<i64: 2, 1, 96>}, {pipeline_mode = #tpu.pipeline_mode<synchronous>, transform_indices = @transform_6, window_bounds = array<i64: 2, 32, 32>}, {pipeline_mode = #tpu.pipeline_mode<synchronous>, transform_indices = @transform_7, window_bounds = array<i64: 2, 1, 32>}, {pipeline_mode = #tpu.pipeline_mode<synchronous>, transform_indices = @transform_8, window_bounds = array<i64: 2, 1, 32>}, {pipeline_mode = #tpu.pipeline_mode<synchronous>, transform_indices = @transform_9, window_bounds = array<i64: 2, 1, 32>}, {pipeline_mode = #tpu.pipeline_mode<synchronous>, transform_indices = @transform_10, window_bounds = array<i64: 2, 32, 64>}, {pipeline_mode = #tpu.pipeline_mode<synchronous>, transform_indices = @transform_11, window_bounds = array<i64: 2, 1, 64>}, {pipeline_mode = #tpu.pipeline_mode<synchronous>, transform_indices = @transform_12, window_bounds = array<i64: 2, 64, 32>}, {pipeline_mode = #tpu.pipeline_mode<synchronous>, transform_indices = @transform_13, window_bounds = array<i64: 2, 1, 32>}, {pipeline_mode = #tpu.pipeline_mode<synchronous>, transform_indices = @transform_14, window_bounds = array<i64: 2, 1, 32>}, {pipeline_mode = #tpu.pipeline_mode<synchronous>, transform_indices = @transform_15, window_bounds = array<i64: 2, 1, 32>}, {pipeline_mode = #tpu.pipeline_mode<synchronous>, transform_indices = @transform_16, window_bounds = array<i64: 16, 32>}]} {
    %c0 = arith.constant 0 : index
    %c0_0 = arith.constant 0 : index
    %0 = vector.load %arg1[%c0, %c0_0] : memref<16x32xf32, #tpu.memory_space<vmem>>, vector<16x32xf32>
    %c0_1 = arith.constant 0 : index
    %c0_2 = arith.constant 0 : index
    %1 = vector.load %arg2[%c0_1, %c0_2] : memref<2x8xf32, #tpu.memory_space<vmem>>, vector<2x8xf32>
    %c0_3 = arith.constant 0 : index
    %c0_4 = arith.constant 0 : index
    %2 = vector.load %arg3[%c0_3, %c0_4] : memref<1x32xf32, #tpu.memory_space<vmem>>, vector<1x32xf32>
    %c0_5 = arith.constant 0 : index
    %c0_6 = arith.constant 0 : index
    %3 = vector.load %arg4[%c0_5, %c0_6] : memref<1x32xf32, #tpu.memory_space<vmem>>, vector<1x32xf32>
    %cst = arith.constant dense<0.000000e+00> : vector<16xf32>
    %4 = vector.multi_reduction <add>, %0, %cst [1] : vector<16x32xf32> to vector<16xf32>
    %5 = vector.shape_cast %4 : vector<16xf32> to vector<16x1xf32>
    %cst_7 = arith.constant 3.200000e+01 : f32
    %6 = vector.broadcast %cst_7 : f32 to vector<16x1xf32>
    %7 = arith.divf %5, %6 : vector<16x1xf32>
    %8 = vector.broadcast %7 : vector<16x1xf32> to vector<16x32xf32>
    %9 = arith.subf %0, %8 : vector<16x32xf32>
    %10 = vector.broadcast %7 : vector<16x1xf32> to vector<16x32xf32>
    %11 = arith.subf %0, %10 : vector<16x32xf32>
    %12 = arith.mulf %9, %11 : vector<16x32xf32>
    %cst_8 = arith.constant dense<0.000000e+00> : vector<16xf32>
    %13 = vector.multi_reduction <add>, %12, %cst_8 [1] : vector<16x32xf32> to vector<16xf32>
    %14 = vector.shape_cast %13 : vector<16xf32> to vector<16x1xf32>
    %cst_9 = arith.constant 3.200000e+01 : f32
    %15 = vector.broadcast %cst_9 : f32 to vector<16x1xf32>
    %16 = arith.divf %14, %15 : vector<16x1xf32>
    %cst_10 = arith.constant 9.99999996E-13 : f32
    %17 = vector.broadcast %cst_10 : f32 to vector<16x1xf32>
    %18 = arith.addf %16, %17 : vector<16x1xf32>
    %19 = math.rsqrt %18 : vector<16x1xf32>
    %20 = vector.broadcast %7 : vector<16x1xf32> to vector<16x32xf32>
    %21 = arith.subf %0, %20 : vector<16x32xf32>
    %22 = vector.broadcast %19 : vector<16x1xf32> to vector<16x32xf32>
    %23 = arith.mulf %21, %22 : vector<16x32xf32>
    %24 = vector.broadcast %2 : vector<1x32xf32> to vector<16x32xf32>
    %25 = arith.mulf %23, %24 : vector<16x32xf32>
    %26 = vector.broadcast %3 : vector<1x32xf32> to vector<16x32xf32>
    %27 = arith.addf %25, %26 : vector<16x32xf32>
    %c0_11 = arith.constant 0 : index
    %c0_12 = arith.constant 0 : index
    %c0_13 = arith.constant 0 : index
    %28 = vector.load %arg5[%c0_11, %c0_12, %c0_13] : memref<2x32x96xf32, #tpu.memory_space<vmem>>, vector<1x32x96xf32>
    %29 = vector.shape_cast %28 : vector<1x32x96xf32> to vector<32x96xf32>
    %c0_14 = arith.constant 0 : index
    %c0_15 = arith.constant 0 : index
    %c0_16 = arith.constant 0 : index
    %30 = vector.load %arg6[%c0_14, %c0_15, %c0_16] : memref<2x1x96xf32, #tpu.memory_space<vmem>>, vector<1x1x96xf32>
    %31 = vector.shape_cast %30 : vector<1x1x96xf32> to vector<1x96xf32>
    %c0_17 = arith.constant 0 : index
    %c0_18 = arith.constant 0 : index
    %c0_19 = arith.constant 0 : index
    %32 = vector.load %arg7[%c0_17, %c0_18, %c0_19] : memref<2x32x32xf32, #tpu.memory_space<vmem>>, vector<1x32x32xf32>
    %33 = vector.shape_cast %32 : vector<1x32x32xf32> to vector<32x32xf32>
    %c0_20 = arith.constant 0 : index
    %c0_21 = arith.constant 0 : index
    %c0_22 = arith.constant 0 : index
    %34 = vector.load %arg8[%c0_20, %c0_21, %c0_22] : memref<2x1x32xf32, #tpu.memory_space<vmem>>, vector<1x1x32xf32>
    %35 = vector.shape_cast %34 : vector<1x1x32xf32> to vector<1x32xf32>
    %cst_23 = arith.constant dense<0.000000e+00> : vector<16x96xf32>
    %36 = tpu.matmul %27, %29, %cst_23 {dimension_numbers = #tpu.dot_dimension_numbers<[1], [0], [0], [1], [0, 0, 1, 1], [], []>} : vector<16x32xf32>, vector<32x96xf32>, vector<16x96xf32> -> vector<16x96xf32>
    %37 = vector.broadcast %31 : vector<1x96xf32> to vector<16x96xf32>
    %38 = arith.addf %36, %37 : vector<16x96xf32>
    %39 = vector.extract_strided_slice %38 {offsets = [0, 0], sizes = [16, 32], strides = [1, 1]} : vector<16x96xf32> to vector<16x32xf32>
    %40 = vector.extract_strided_slice %38 {offsets = [0, 32], sizes = [16, 32], strides = [1, 1]} : vector<16x96xf32> to vector<16x32xf32>
    %41 = vector.extract_strided_slice %38 {offsets = [0, 64], sizes = [16, 32], strides = [1, 1]} : vector<16x96xf32> to vector<16x32xf32>
    %42 = vector.extract_strided_slice %1 {offsets = [0, 0], sizes = [1, 8], strides = [1, 1]} : vector<2x8xf32> to vector<1x8xf32>
    %cst_24 = arith.constant 0.000000e+00 : f32
    %43 = vector.broadcast %cst_24 : f32 to vector<8x32xf32>
    %44 = vector.extract_strided_slice %39 {offsets = [0, 0], sizes = [8, 16], strides = [1, 1]} : vector<16x32xf32> to vector<8x16xf32>
    %45 = vector.extract_strided_slice %40 {offsets = [0, 0], sizes = [8, 16], strides = [1, 1]} : vector<16x32xf32> to vector<8x16xf32>
    %46 = vector.extract_strided_slice %41 {offsets = [0, 0], sizes = [8, 16], strides = [1, 1]} : vector<16x32xf32> to vector<8x16xf32>
    %cst_25 = arith.constant dense<0.000000e+00> : vector<8x8xf32>
    %47 = tpu.matmul %44, %45, %cst_25 {dimension_numbers = #tpu.dot_dimension_numbers<[1], [1], [0], [0], [0, 0, 1, 0], [], []>} : vector<8x16xf32>, vector<8x16xf32>, vector<8x8xf32> -> vector<8x8xf32>
    %cst_26 = arith.constant 2.500000e-01 : f32
    %48 = vector.broadcast %cst_26 : f32 to vector<8x8xf32>
    %49 = arith.mulf %47, %48 : vector<8x8xf32>
    %50 = vector.broadcast %42 : vector<1x8xf32> to vector<8x8xf32>
    %51 = arith.addf %49, %50 : vector<8x8xf32>
    %cst_27 = arith.constant dense<0xFF800000> : vector<8xf32>
    %52 = vector.multi_reduction <maximumf>, %51, %cst_27 [1] : vector<8x8xf32> to vector<8xf32>
    %53 = vector.shape_cast %52 : vector<8xf32> to vector<8x1xf32>
    %54 = vector.broadcast %53 : vector<8x1xf32> to vector<8x8xf32>
    %55 = arith.subf %51, %54 : vector<8x8xf32>
    %56 = math.exp %55 : vector<8x8xf32>
    %cst_28 = arith.constant dense<0.000000e+00> : vector<8xf32>
    %57 = vector.multi_reduction <add>, %56, %cst_28 [1] : vector<8x8xf32> to vector<8xf32>
    %58 = vector.shape_cast %57 : vector<8xf32> to vector<8x1xf32>
    %59 = vector.broadcast %58 : vector<8x1xf32> to vector<8x8xf32>
    %60 = arith.divf %56, %59 : vector<8x8xf32>
    %cst_29 = arith.constant dense<0.000000e+00> : vector<8x16xf32>
    %61 = tpu.matmul %60, %46, %cst_29 {dimension_numbers = #tpu.dot_dimension_numbers<[1], [0], [0], [1], [0, 0, 1, 1], [], []>} : vector<8x8xf32>, vector<8x16xf32>, vector<8x16xf32> -> vector<8x16xf32>
    %62 = vector.extract_strided_slice %33 {offsets = [0, 0], sizes = [16, 32], strides = [1, 1]} : vector<32x32xf32> to vector<16x32xf32>
    %cst_30 = arith.constant dense<0.000000e+00> : vector<8x32xf32>
    %63 = tpu.matmul %61, %62, %cst_30 {dimension_numbers = #tpu.dot_dimension_numbers<[1], [0], [0], [1], [0, 0, 1, 1], [], []>} : vector<8x16xf32>, vector<16x32xf32>, vector<8x32xf32> -> vector<8x32xf32>
    %64 = arith.addf %43, %63 : vector<8x32xf32>
    %65 = vector.extract_strided_slice %39 {offsets = [0, 16], sizes = [8, 16], strides = [1, 1]} : vector<16x32xf32> to vector<8x16xf32>
    %66 = vector.extract_strided_slice %40 {offsets = [0, 16], sizes = [8, 16], strides = [1, 1]} : vector<16x32xf32> to vector<8x16xf32>
    %67 = vector.extract_strided_slice %41 {offsets = [0, 16], sizes = [8, 16], strides = [1, 1]} : vector<16x32xf32> to vector<8x16xf32>
    %cst_31 = arith.constant dense<0.000000e+00> : vector<8x8xf32>
    %68 = tpu.matmul %65, %66, %cst_31 {dimension_numbers = #tpu.dot_dimension_numbers<[1], [1], [0], [0], [0, 0, 1, 0], [], []>} : vector<8x16xf32>, vector<8x16xf32>, vector<8x8xf32> -> vector<8x8xf32>
    %cst_32 = arith.constant 2.500000e-01 : f32
    %69 = vector.broadcast %cst_32 : f32 to vector<8x8xf32>
    %70 = arith.mulf %68, %69 : vector<8x8xf32>
    %71 = vector.broadcast %42 : vector<1x8xf32> to vector<8x8xf32>
    %72 = arith.addf %70, %71 : vector<8x8xf32>
    %cst_33 = arith.constant dense<0xFF800000> : vector<8xf32>
    %73 = vector.multi_reduction <maximumf>, %72, %cst_33 [1] : vector<8x8xf32> to vector<8xf32>
    %74 = vector.shape_cast %73 : vector<8xf32> to vector<8x1xf32>
    %75 = vector.broadcast %74 : vector<8x1xf32> to vector<8x8xf32>
    %76 = arith.subf %72, %75 : vector<8x8xf32>
    %77 = math.exp %76 : vector<8x8xf32>
    %cst_34 = arith.constant dense<0.000000e+00> : vector<8xf32>
    %78 = vector.multi_reduction <add>, %77, %cst_34 [1] : vector<8x8xf32> to vector<8xf32>
    %79 = vector.shape_cast %78 : vector<8xf32> to vector<8x1xf32>
    %80 = vector.broadcast %79 : vector<8x1xf32> to vector<8x8xf32>
    %81 = arith.divf %77, %80 : vector<8x8xf32>
    %cst_35 = arith.constant dense<0.000000e+00> : vector<8x16xf32>
    %82 = tpu.matmul %81, %67, %cst_35 {dimension_numbers = #tpu.dot_dimension_numbers<[1], [0], [0], [1], [0, 0, 1, 1], [], []>} : vector<8x8xf32>, vector<8x16xf32>, vector<8x16xf32> -> vector<8x16xf32>
    %83 = vector.extract_strided_slice %33 {offsets = [16, 0], sizes = [16, 32], strides = [1, 1]} : vector<32x32xf32> to vector<16x32xf32>
    %cst_36 = arith.constant dense<0.000000e+00> : vector<8x32xf32>
    %84 = tpu.matmul %82, %83, %cst_36 {dimension_numbers = #tpu.dot_dimension_numbers<[1], [0], [0], [1], [0, 0, 1, 1], [], []>} : vector<8x16xf32>, vector<16x32xf32>, vector<8x32xf32> -> vector<8x32xf32>
    %85 = arith.addf %64, %84 : vector<8x32xf32>
    %86 = vector.extract_strided_slice %1 {offsets = [1, 0], sizes = [1, 8], strides = [1, 1]} : vector<2x8xf32> to vector<1x8xf32>
    %cst_37 = arith.constant 0.000000e+00 : f32
    %87 = vector.broadcast %cst_37 : f32 to vector<8x32xf32>
    %88 = vector.extract_strided_slice %39 {offsets = [8, 0], sizes = [8, 16], strides = [1, 1]} : vector<16x32xf32> to vector<8x16xf32>
    %89 = vector.extract_strided_slice %40 {offsets = [8, 0], sizes = [8, 16], strides = [1, 1]} : vector<16x32xf32> to vector<8x16xf32>
    %90 = vector.extract_strided_slice %41 {offsets = [8, 0], sizes = [8, 16], strides = [1, 1]} : vector<16x32xf32> to vector<8x16xf32>
    %cst_38 = arith.constant dense<0.000000e+00> : vector<8x8xf32>
    %91 = tpu.matmul %88, %89, %cst_38 {dimension_numbers = #tpu.dot_dimension_numbers<[1], [1], [0], [0], [0, 0, 1, 0], [], []>} : vector<8x16xf32>, vector<8x16xf32>, vector<8x8xf32> -> vector<8x8xf32>
    %cst_39 = arith.constant 2.500000e-01 : f32
    %92 = vector.broadcast %cst_39 : f32 to vector<8x8xf32>
    %93 = arith.mulf %91, %92 : vector<8x8xf32>
    %94 = vector.broadcast %86 : vector<1x8xf32> to vector<8x8xf32>
    %95 = arith.addf %93, %94 : vector<8x8xf32>
    %cst_40 = arith.constant dense<0xFF800000> : vector<8xf32>
    %96 = vector.multi_reduction <maximumf>, %95, %cst_40 [1] : vector<8x8xf32> to vector<8xf32>
    %97 = vector.shape_cast %96 : vector<8xf32> to vector<8x1xf32>
    %98 = vector.broadcast %97 : vector<8x1xf32> to vector<8x8xf32>
    %99 = arith.subf %95, %98 : vector<8x8xf32>
    %100 = math.exp %99 : vector<8x8xf32>
    %cst_41 = arith.constant dense<0.000000e+00> : vector<8xf32>
    %101 = vector.multi_reduction <add>, %100, %cst_41 [1] : vector<8x8xf32> to vector<8xf32>
    %102 = vector.shape_cast %101 : vector<8xf32> to vector<8x1xf32>
    %103 = vector.broadcast %102 : vector<8x1xf32> to vector<8x8xf32>
    %104 = arith.divf %100, %103 : vector<8x8xf32>
    %cst_42 = arith.constant dense<0.000000e+00> : vector<8x16xf32>
    %105 = tpu.matmul %104, %90, %cst_42 {dimension_numbers = #tpu.dot_dimension_numbers<[1], [0], [0], [1], [0, 0, 1, 1], [], []>} : vector<8x8xf32>, vector<8x16xf32>, vector<8x16xf32> -> vector<8x16xf32>
    %106 = vector.extract_strided_slice %33 {offsets = [0, 0], sizes = [16, 32], strides = [1, 1]} : vector<32x32xf32> to vector<16x32xf32>
    %cst_43 = arith.constant dense<0.000000e+00> : vector<8x32xf32>
    %107 = tpu.matmul %105, %106, %cst_43 {dimension_numbers = #tpu.dot_dimension_numbers<[1], [0], [0], [1], [0, 0, 1, 1], [], []>} : vector<8x16xf32>, vector<16x32xf32>, vector<8x32xf32> -> vector<8x32xf32>
    %108 = arith.addf %87, %107 : vector<8x32xf32>
    %109 = vector.extract_strided_slice %39 {offsets = [8, 16], sizes = [8, 16], strides = [1, 1]} : vector<16x32xf32> to vector<8x16xf32>
    %110 = vector.extract_strided_slice %40 {offsets = [8, 16], sizes = [8, 16], strides = [1, 1]} : vector<16x32xf32> to vector<8x16xf32>
    %111 = vector.extract_strided_slice %41 {offsets = [8, 16], sizes = [8, 16], strides = [1, 1]} : vector<16x32xf32> to vector<8x16xf32>
    %cst_44 = arith.constant dense<0.000000e+00> : vector<8x8xf32>
    %112 = tpu.matmul %109, %110, %cst_44 {dimension_numbers = #tpu.dot_dimension_numbers<[1], [1], [0], [0], [0, 0, 1, 0], [], []>} : vector<8x16xf32>, vector<8x16xf32>, vector<8x8xf32> -> vector<8x8xf32>
    %cst_45 = arith.constant 2.500000e-01 : f32
    %113 = vector.broadcast %cst_45 : f32 to vector<8x8xf32>
    %114 = arith.mulf %112, %113 : vector<8x8xf32>
    %115 = vector.broadcast %86 : vector<1x8xf32> to vector<8x8xf32>
    %116 = arith.addf %114, %115 : vector<8x8xf32>
    %cst_46 = arith.constant dense<0xFF800000> : vector<8xf32>
    %117 = vector.multi_reduction <maximumf>, %116, %cst_46 [1] : vector<8x8xf32> to vector<8xf32>
    %118 = vector.shape_cast %117 : vector<8xf32> to vector<8x1xf32>
    %119 = vector.broadcast %118 : vector<8x1xf32> to vector<8x8xf32>
    %120 = arith.subf %116, %119 : vector<8x8xf32>
    %121 = math.exp %120 : vector<8x8xf32>
    %cst_47 = arith.constant dense<0.000000e+00> : vector<8xf32>
    %122 = vector.multi_reduction <add>, %121, %cst_47 [1] : vector<8x8xf32> to vector<8xf32>
    %123 = vector.shape_cast %122 : vector<8xf32> to vector<8x1xf32>
    %124 = vector.broadcast %123 : vector<8x1xf32> to vector<8x8xf32>
    %125 = arith.divf %121, %124 : vector<8x8xf32>
    %cst_48 = arith.constant dense<0.000000e+00> : vector<8x16xf32>
    %126 = tpu.matmul %125, %111, %cst_48 {dimension_numbers = #tpu.dot_dimension_numbers<[1], [0], [0], [1], [0, 0, 1, 1], [], []>} : vector<8x8xf32>, vector<8x16xf32>, vector<8x16xf32> -> vector<8x16xf32>
    %127 = vector.extract_strided_slice %33 {offsets = [16, 0], sizes = [16, 32], strides = [1, 1]} : vector<32x32xf32> to vector<16x32xf32>
    %cst_49 = arith.constant dense<0.000000e+00> : vector<8x32xf32>
    %128 = tpu.matmul %126, %127, %cst_49 {dimension_numbers = #tpu.dot_dimension_numbers<[1], [0], [0], [1], [0, 0, 1, 1], [], []>} : vector<8x16xf32>, vector<16x32xf32>, vector<8x32xf32> -> vector<8x32xf32>
    %129 = arith.addf %108, %128 : vector<8x32xf32>
    %130 = tpu.concatenate %85, %129 in 0 : vector<8x32xf32>, vector<8x32xf32> -> vector<16x32xf32>
    %131 = vector.broadcast %35 : vector<1x32xf32> to vector<16x32xf32>
    %132 = arith.addf %130, %131 : vector<16x32xf32>
    %133 = arith.addf %27, %132 : vector<16x32xf32>
    %c0_50 = arith.constant 0 : index
    %c0_51 = arith.constant 0 : index
    %c0_52 = arith.constant 0 : index
    %134 = vector.load %arg9[%c0_50, %c0_51, %c0_52] : memref<2x1x32xf32, #tpu.memory_space<vmem>>, vector<1x1x32xf32>
    %135 = vector.shape_cast %134 : vector<1x1x32xf32> to vector<1x32xf32>
    %c0_53 = arith.constant 0 : index
    %c0_54 = arith.constant 0 : index
    %c0_55 = arith.constant 0 : index
    %136 = vector.load %arg10[%c0_53, %c0_54, %c0_55] : memref<2x1x32xf32, #tpu.memory_space<vmem>>, vector<1x1x32xf32>
    %137 = vector.shape_cast %136 : vector<1x1x32xf32> to vector<1x32xf32>
    %cst_56 = arith.constant dense<0.000000e+00> : vector<16xf32>
    %138 = vector.multi_reduction <add>, %133, %cst_56 [1] : vector<16x32xf32> to vector<16xf32>
    %139 = vector.shape_cast %138 : vector<16xf32> to vector<16x1xf32>
    %cst_57 = arith.constant 3.200000e+01 : f32
    %140 = vector.broadcast %cst_57 : f32 to vector<16x1xf32>
    %141 = arith.divf %139, %140 : vector<16x1xf32>
    %142 = vector.broadcast %141 : vector<16x1xf32> to vector<16x32xf32>
    %143 = arith.subf %133, %142 : vector<16x32xf32>
    %144 = vector.broadcast %141 : vector<16x1xf32> to vector<16x32xf32>
    %145 = arith.subf %133, %144 : vector<16x32xf32>
    %146 = arith.mulf %143, %145 : vector<16x32xf32>
    %cst_58 = arith.constant dense<0.000000e+00> : vector<16xf32>
    %147 = vector.multi_reduction <add>, %146, %cst_58 [1] : vector<16x32xf32> to vector<16xf32>
    %148 = vector.shape_cast %147 : vector<16xf32> to vector<16x1xf32>
    %cst_59 = arith.constant 3.200000e+01 : f32
    %149 = vector.broadcast %cst_59 : f32 to vector<16x1xf32>
    %150 = arith.divf %148, %149 : vector<16x1xf32>
    %cst_60 = arith.constant 9.99999996E-13 : f32
    %151 = vector.broadcast %cst_60 : f32 to vector<16x1xf32>
    %152 = arith.addf %150, %151 : vector<16x1xf32>
    %153 = math.rsqrt %152 : vector<16x1xf32>
    %154 = vector.broadcast %141 : vector<16x1xf32> to vector<16x32xf32>
    %155 = arith.subf %133, %154 : vector<16x32xf32>
    %156 = vector.broadcast %153 : vector<16x1xf32> to vector<16x32xf32>
    %157 = arith.mulf %155, %156 : vector<16x32xf32>
    %158 = vector.broadcast %135 : vector<1x32xf32> to vector<16x32xf32>
    %159 = arith.mulf %157, %158 : vector<16x32xf32>
    %160 = vector.broadcast %137 : vector<1x32xf32> to vector<16x32xf32>
    %161 = arith.addf %159, %160 : vector<16x32xf32>
    %c0_61 = arith.constant 0 : index
    %c0_62 = arith.constant 0 : index
    %c0_63 = arith.constant 0 : index
    %162 = vector.load %arg11[%c0_61, %c0_62, %c0_63] : memref<2x32x64xf32, #tpu.memory_space<vmem>>, vector<1x32x64xf32>
    %163 = vector.shape_cast %162 : vector<1x32x64xf32> to vector<32x64xf32>
    %cst_64 = arith.constant dense<0.000000e+00> : vector<16x64xf32>
    %164 = tpu.matmul %161, %163, %cst_64 {dimension_numbers = #tpu.dot_dimension_numbers<[1], [0], [0], [1], [0, 0, 1, 1], [], []>} : vector<16x32xf32>, vector<32x64xf32>, vector<16x64xf32> -> vector<16x64xf32>
    %c0_65 = arith.constant 0 : index
    %c0_66 = arith.constant 0 : index
    %c0_67 = arith.constant 0 : index
    %165 = vector.load %arg12[%c0_65, %c0_66, %c0_67] : memref<2x1x64xf32, #tpu.memory_space<vmem>>, vector<1x1x64xf32>
    %166 = vector.shape_cast %165 : vector<1x1x64xf32> to vector<1x64xf32>
    %167 = vector.broadcast %166 : vector<1x64xf32> to vector<16x64xf32>
    %168 = arith.addf %164, %167 : vector<16x64xf32>
    %cst_68 = arith.constant 5.000000e-01 : f32
    %169 = vector.broadcast %cst_68 : f32 to vector<16x64xf32>
    %170 = arith.mulf %169, %168 : vector<16x64xf32>
    %cst_69 = arith.constant 4.471500e-02 : f32
    %171 = vector.broadcast %cst_69 : f32 to vector<16x64xf32>
    %172 = arith.mulf %171, %168 : vector<16x64xf32>
    %173 = arith.mulf %172, %168 : vector<16x64xf32>
    %174 = arith.mulf %173, %168 : vector<16x64xf32>
    %175 = arith.addf %168, %174 : vector<16x64xf32>
    %cst_70 = arith.constant 0.797884583 : f32
    %176 = vector.broadcast %cst_70 : f32 to vector<16x64xf32>
    %177 = arith.mulf %176, %175 : vector<16x64xf32>
    %178 = math.tanh %177 : vector<16x64xf32>
    %cst_71 = arith.constant 1.000000e+00 : f32
    %179 = vector.broadcast %cst_71 : f32 to vector<16x64xf32>
    %180 = arith.addf %179, %178 : vector<16x64xf32>
    %181 = arith.mulf %170, %180 : vector<16x64xf32>
    %c0_72 = arith.constant 0 : index
    %c0_73 = arith.constant 0 : index
    %c0_74 = arith.constant 0 : index
    %182 = vector.load %arg13[%c0_72, %c0_73, %c0_74] : memref<2x64x32xf32, #tpu.memory_space<vmem>>, vector<1x64x32xf32>
    %183 = vector.shape_cast %182 : vector<1x64x32xf32> to vector<64x32xf32>
    %cst_75 = arith.constant dense<0.000000e+00> : vector<16x32xf32>
    %184 = tpu.matmul %181, %183, %cst_75 {dimension_numbers = #tpu.dot_dimension_numbers<[1], [0], [0], [1], [0, 0, 1, 1], [], []>} : vector<16x64xf32>, vector<64x32xf32>, vector<16x32xf32> -> vector<16x32xf32>
    %c0_76 = arith.constant 0 : index
    %c0_77 = arith.constant 0 : index
    %c0_78 = arith.constant 0 : index
    %185 = vector.load %arg14[%c0_76, %c0_77, %c0_78] : memref<2x1x32xf32, #tpu.memory_space<vmem>>, vector<1x1x32xf32>
    %186 = vector.shape_cast %185 : vector<1x1x32xf32> to vector<1x32xf32>
    %187 = vector.broadcast %186 : vector<1x32xf32> to vector<16x32xf32>
    %188 = arith.addf %184, %187 : vector<16x32xf32>
    %189 = arith.addf %161, %188 : vector<16x32xf32>
    %c0_79 = arith.constant 0 : index
    %c0_80 = arith.constant 0 : index
    %c0_81 = arith.constant 0 : index
    %190 = vector.load %arg15[%c0_79, %c0_80, %c0_81] : memref<2x1x32xf32, #tpu.memory_space<vmem>>, vector<1x1x32xf32>
    %191 = vector.shape_cast %190 : vector<1x1x32xf32> to vector<1x32xf32>
    %c0_82 = arith.constant 0 : index
    %c0_83 = arith.constant 0 : index
    %c0_84 = arith.constant 0 : index
    %192 = vector.load %arg16[%c0_82, %c0_83, %c0_84] : memref<2x1x32xf32, #tpu.memory_space<vmem>>, vector<1x1x32xf32>
    %193 = vector.shape_cast %192 : vector<1x1x32xf32> to vector<1x32xf32>
    %cst_85 = arith.constant dense<0.000000e+00> : vector<16xf32>
    %194 = vector.multi_reduction <add>, %189, %cst_85 [1] : vector<16x32xf32> to vector<16xf32>
    %195 = vector.shape_cast %194 : vector<16xf32> to vector<16x1xf32>
    %cst_86 = arith.constant 3.200000e+01 : f32
    %196 = vector.broadcast %cst_86 : f32 to vector<16x1xf32>
    %197 = arith.divf %195, %196 : vector<16x1xf32>
    %198 = vector.broadcast %197 : vector<16x1xf32> to vector<16x32xf32>
    %199 = arith.subf %189, %198 : vector<16x32xf32>
    %200 = vector.broadcast %197 : vector<16x1xf32> to vector<16x32xf32>
    %201 = arith.subf %189, %200 : vector<16x32xf32>
    %202 = arith.mulf %199, %201 : vector<16x32xf32>
    %cst_87 = arith.constant dense<0.000000e+00> : vector<16xf32>
    %203 = vector.multi_reduction <add>, %202, %cst_87 [1] : vector<16x32xf32> to vector<16xf32>
    %204 = vector.shape_cast %203 : vector<16xf32> to vector<16x1xf32>
    %cst_88 = arith.constant 3.200000e+01 : f32
    %205 = vector.broadcast %cst_88 : f32 to vector<16x1xf32>
    %206 = arith.divf %204, %205 : vector<16x1xf32>
    %cst_89 = arith.constant 9.99999996E-13 : f32
    %207 = vector.broadcast %cst_89 : f32 to vector<16x1xf32>
    %208 = arith.addf %206, %207 : vector<16x1xf32>
    %209 = math.rsqrt %208 : vector<16x1xf32>
    %210 = vector.broadcast %197 : vector<16x1xf32> to vector<16x32xf32>
    %211 = arith.subf %189, %210 : vector<16x32xf32>
    %212 = vector.broadcast %209 : vector<16x1xf32> to vector<16x32xf32>
    %213 = arith.mulf %211, %212 : vector<16x32xf32>
    %214 = vector.broadcast %191 : vector<1x32xf32> to vector<16x32xf32>
    %215 = arith.mulf %213, %214 : vector<16x32xf32>
    %216 = vector.broadcast %193 : vector<1x32xf32> to vector<16x32xf32>
    %217 = arith.addf %215, %216 : vector<16x32xf32>
    %c1 = arith.constant 1 : index
    %c0_90 = arith.constant 0 : index
    %c0_91 = arith.constant 0 : index
    %218 = vector.load %arg5[%c1, %c0_90, %c0_91] : memref<2x32x96xf32, #tpu.memory_space<vmem>>, vector<1x32x96xf32>
    %219 = vector.shape_cast %218 : vector<1x32x96xf32> to vector<32x96xf32>
    %c1_92 = arith.constant 1 : index
    %c0_93 = arith.constant 0 : index
    %c0_94 = arith.constant 0 : index
    %220 = vector.load %arg6[%c1_92, %c0_93, %c0_94] : memref<2x1x96xf32, #tpu.memory_space<vmem>>, vector<1x1x96xf32>
    %221 = vector.shape_cast %220 : vector<1x1x96xf32> to vector<1x96xf32>
    %c1_95 = arith.constant 1 : index
    %c0_96 = arith.constant 0 : index
    %c0_97 = arith.constant 0 : index
    %222 = vector.load %arg7[%c1_95, %c0_96, %c0_97] : memref<2x32x32xf32, #tpu.memory_space<vmem>>, vector<1x32x32xf32>
    %223 = vector.shape_cast %222 : vector<1x32x32xf32> to vector<32x32xf32>
    %c1_98 = arith.constant 1 : index
    %c0_99 = arith.constant 0 : index
    %c0_100 = arith.constant 0 : index
    %224 = vector.load %arg8[%c1_98, %c0_99, %c0_100] : memref<2x1x32xf32, #tpu.memory_space<vmem>>, vector<1x1x32xf32>
    %225 = vector.shape_cast %224 : vector<1x1x32xf32> to vector<1x32xf32>
    %cst_101 = arith.constant dense<0.000000e+00> : vector<16x96xf32>
    %226 = tpu.matmul %217, %219, %cst_101 {dimension_numbers = #tpu.dot_dimension_numbers<[1], [0], [0], [1], [0, 0, 1, 1], [], []>} : vector<16x32xf32>, vector<32x96xf32>, vector<16x96xf32> -> vector<16x96xf32>
    %227 = vector.broadcast %221 : vector<1x96xf32> to vector<16x96xf32>
    %228 = arith.addf %226, %227 : vector<16x96xf32>
    %229 = vector.extract_strided_slice %228 {offsets = [0, 0], sizes = [16, 32], strides = [1, 1]} : vector<16x96xf32> to vector<16x32xf32>
    %230 = vector.extract_strided_slice %228 {offsets = [0, 32], sizes = [16, 32], strides = [1, 1]} : vector<16x96xf32> to vector<16x32xf32>
    %231 = vector.extract_strided_slice %228 {offsets = [0, 64], sizes = [16, 32], strides = [1, 1]} : vector<16x96xf32> to vector<16x32xf32>
    %232 = vector.extract_strided_slice %1 {offsets = [0, 0], sizes = [1, 8], strides = [1, 1]} : vector<2x8xf32> to vector<1x8xf32>
    %cst_102 = arith.constant 0.000000e+00 : f32
    %233 = vector.broadcast %cst_102 : f32 to vector<8x32xf32>
    %234 = vector.extract_strided_slice %229 {offsets = [0, 0], sizes = [8, 16], strides = [1, 1]} : vector<16x32xf32> to vector<8x16xf32>
    %235 = vector.extract_strided_slice %230 {offsets = [0, 0], sizes = [8, 16], strides = [1, 1]} : vector<16x32xf32> to vector<8x16xf32>
    %236 = vector.extract_strided_slice %231 {offsets = [0, 0], sizes = [8, 16], strides = [1, 1]} : vector<16x32xf32> to vector<8x16xf32>
    %cst_103 = arith.constant dense<0.000000e+00> : vector<8x8xf32>
    %237 = tpu.matmul %234, %235, %cst_103 {dimension_numbers = #tpu.dot_dimension_numbers<[1], [1], [0], [0], [0, 0, 1, 0], [], []>} : vector<8x16xf32>, vector<8x16xf32>, vector<8x8xf32> -> vector<8x8xf32>
    %cst_104 = arith.constant 2.500000e-01 : f32
    %238 = vector.broadcast %cst_104 : f32 to vector<8x8xf32>
    %239 = arith.mulf %237, %238 : vector<8x8xf32>
    %240 = vector.broadcast %232 : vector<1x8xf32> to vector<8x8xf32>
    %241 = arith.addf %239, %240 : vector<8x8xf32>
    %cst_105 = arith.constant dense<0xFF800000> : vector<8xf32>
    %242 = vector.multi_reduction <maximumf>, %241, %cst_105 [1] : vector<8x8xf32> to vector<8xf32>
    %243 = vector.shape_cast %242 : vector<8xf32> to vector<8x1xf32>
    %244 = vector.broadcast %243 : vector<8x1xf32> to vector<8x8xf32>
    %245 = arith.subf %241, %244 : vector<8x8xf32>
    %246 = math.exp %245 : vector<8x8xf32>
    %cst_106 = arith.constant dense<0.000000e+00> : vector<8xf32>
    %247 = vector.multi_reduction <add>, %246, %cst_106 [1] : vector<8x8xf32> to vector<8xf32>
    %248 = vector.shape_cast %247 : vector<8xf32> to vector<8x1xf32>
    %249 = vector.broadcast %248 : vector<8x1xf32> to vector<8x8xf32>
    %250 = arith.divf %246, %249 : vector<8x8xf32>
    %cst_107 = arith.constant dense<0.000000e+00> : vector<8x16xf32>
    %251 = tpu.matmul %250, %236, %cst_107 {dimension_numbers = #tpu.dot_dimension_numbers<[1], [0], [0], [1], [0, 0, 1, 1], [], []>} : vector<8x8xf32>, vector<8x16xf32>, vector<8x16xf32> -> vector<8x16xf32>
    %252 = vector.extract_strided_slice %223 {offsets = [0, 0], sizes = [16, 32], strides = [1, 1]} : vector<32x32xf32> to vector<16x32xf32>
    %cst_108 = arith.constant dense<0.000000e+00> : vector<8x32xf32>
    %253 = tpu.matmul %251, %252, %cst_108 {dimension_numbers = #tpu.dot_dimension_numbers<[1], [0], [0], [1], [0, 0, 1, 1], [], []>} : vector<8x16xf32>, vector<16x32xf32>, vector<8x32xf32> -> vector<8x32xf32>
    %254 = arith.addf %233, %253 : vector<8x32xf32>
    %255 = vector.extract_strided_slice %229 {offsets = [0, 16], sizes = [8, 16], strides = [1, 1]} : vector<16x32xf32> to vector<8x16xf32>
    %256 = vector.extract_strided_slice %230 {offsets = [0, 16], sizes = [8, 16], strides = [1, 1]} : vector<16x32xf32> to vector<8x16xf32>
    %257 = vector.extract_strided_slice %231 {offsets = [0, 16], sizes = [8, 16], strides = [1, 1]} : vector<16x32xf32> to vector<8x16xf32>
    %cst_109 = arith.constant dense<0.000000e+00> : vector<8x8xf32>
    %258 = tpu.matmul %255, %256, %cst_109 {dimension_numbers = #tpu.dot_dimension_numbers<[1], [1], [0], [0], [0, 0, 1, 0], [], []>} : vector<8x16xf32>, vector<8x16xf32>, vector<8x8xf32> -> vector<8x8xf32>
    %cst_110 = arith.constant 2.500000e-01 : f32
    %259 = vector.broadcast %cst_110 : f32 to vector<8x8xf32>
    %260 = arith.mulf %258, %259 : vector<8x8xf32>
    %261 = vector.broadcast %232 : vector<1x8xf32> to vector<8x8xf32>
    %262 = arith.addf %260, %261 : vector<8x8xf32>
    %cst_111 = arith.constant dense<0xFF800000> : vector<8xf32>
    %263 = vector.multi_reduction <maximumf>, %262, %cst_111 [1] : vector<8x8xf32> to vector<8xf32>
    %264 = vector.shape_cast %263 : vector<8xf32> to vector<8x1xf32>
    %265 = vector.broadcast %264 : vector<8x1xf32> to vector<8x8xf32>
    %266 = arith.subf %262, %265 : vector<8x8xf32>
    %267 = math.exp %266 : vector<8x8xf32>
    %cst_112 = arith.constant dense<0.000000e+00> : vector<8xf32>
    %268 = vector.multi_reduction <add>, %267, %cst_112 [1] : vector<8x8xf32> to vector<8xf32>
    %269 = vector.shape_cast %268 : vector<8xf32> to vector<8x1xf32>
    %270 = vector.broadcast %269 : vector<8x1xf32> to vector<8x8xf32>
    %271 = arith.divf %267, %270 : vector<8x8xf32>
    %cst_113 = arith.constant dense<0.000000e+00> : vector<8x16xf32>
    %272 = tpu.matmul %271, %257, %cst_113 {dimension_numbers = #tpu.dot_dimension_numbers<[1], [0], [0], [1], [0, 0, 1, 1], [], []>} : vector<8x8xf32>, vector<8x16xf32>, vector<8x16xf32> -> vector<8x16xf32>
    %273 = vector.extract_strided_slice %223 {offsets = [16, 0], sizes = [16, 32], strides = [1, 1]} : vector<32x32xf32> to vector<16x32xf32>
    %cst_114 = arith.constant dense<0.000000e+00> : vector<8x32xf32>
    %274 = tpu.matmul %272, %273, %cst_114 {dimension_numbers = #tpu.dot_dimension_numbers<[1], [0], [0], [1], [0, 0, 1, 1], [], []>} : vector<8x16xf32>, vector<16x32xf32>, vector<8x32xf32> -> vector<8x32xf32>
    %275 = arith.addf %254, %274 : vector<8x32xf32>
    %276 = vector.extract_strided_slice %1 {offsets = [1, 0], sizes = [1, 8], strides = [1, 1]} : vector<2x8xf32> to vector<1x8xf32>
    %cst_115 = arith.constant 0.000000e+00 : f32
    %277 = vector.broadcast %cst_115 : f32 to vector<8x32xf32>
    %278 = vector.extract_strided_slice %229 {offsets = [8, 0], sizes = [8, 16], strides = [1, 1]} : vector<16x32xf32> to vector<8x16xf32>
    %279 = vector.extract_strided_slice %230 {offsets = [8, 0], sizes = [8, 16], strides = [1, 1]} : vector<16x32xf32> to vector<8x16xf32>
    %280 = vector.extract_strided_slice %231 {offsets = [8, 0], sizes = [8, 16], strides = [1, 1]} : vector<16x32xf32> to vector<8x16xf32>
    %cst_116 = arith.constant dense<0.000000e+00> : vector<8x8xf32>
    %281 = tpu.matmul %278, %279, %cst_116 {dimension_numbers = #tpu.dot_dimension_numbers<[1], [1], [0], [0], [0, 0, 1, 0], [], []>} : vector<8x16xf32>, vector<8x16xf32>, vector<8x8xf32> -> vector<8x8xf32>
    %cst_117 = arith.constant 2.500000e-01 : f32
    %282 = vector.broadcast %cst_117 : f32 to vector<8x8xf32>
    %283 = arith.mulf %281, %282 : vector<8x8xf32>
    %284 = vector.broadcast %276 : vector<1x8xf32> to vector<8x8xf32>
    %285 = arith.addf %283, %284 : vector<8x8xf32>
    %cst_118 = arith.constant dense<0xFF800000> : vector<8xf32>
    %286 = vector.multi_reduction <maximumf>, %285, %cst_118 [1] : vector<8x8xf32> to vector<8xf32>
    %287 = vector.shape_cast %286 : vector<8xf32> to vector<8x1xf32>
    %288 = vector.broadcast %287 : vector<8x1xf32> to vector<8x8xf32>
    %289 = arith.subf %285, %288 : vector<8x8xf32>
    %290 = math.exp %289 : vector<8x8xf32>
    %cst_119 = arith.constant dense<0.000000e+00> : vector<8xf32>
    %291 = vector.multi_reduction <add>, %290, %cst_119 [1] : vector<8x8xf32> to vector<8xf32>
    %292 = vector.shape_cast %291 : vector<8xf32> to vector<8x1xf32>
    %293 = vector.broadcast %292 : vector<8x1xf32> to vector<8x8xf32>
    %294 = arith.divf %290, %293 : vector<8x8xf32>
    %cst_120 = arith.constant dense<0.000000e+00> : vector<8x16xf32>
    %295 = tpu.matmul %294, %280, %cst_120 {dimension_numbers = #tpu.dot_dimension_numbers<[1], [0], [0], [1], [0, 0, 1, 1], [], []>} : vector<8x8xf32>, vector<8x16xf32>, vector<8x16xf32> -> vector<8x16xf32>
    %296 = vector.extract_strided_slice %223 {offsets = [0, 0], sizes = [16, 32], strides = [1, 1]} : vector<32x32xf32> to vector<16x32xf32>
    %cst_121 = arith.constant dense<0.000000e+00> : vector<8x32xf32>
    %297 = tpu.matmul %295, %296, %cst_121 {dimension_numbers = #tpu.dot_dimension_numbers<[1], [0], [0], [1], [0, 0, 1, 1], [], []>} : vector<8x16xf32>, vector<16x32xf32>, vector<8x32xf32> -> vector<8x32xf32>
    %298 = arith.addf %277, %297 : vector<8x32xf32>
    %299 = vector.extract_strided_slice %229 {offsets = [8, 16], sizes = [8, 16], strides = [1, 1]} : vector<16x32xf32> to vector<8x16xf32>
    %300 = vector.extract_strided_slice %230 {offsets = [8, 16], sizes = [8, 16], strides = [1, 1]} : vector<16x32xf32> to vector<8x16xf32>
    %301 = vector.extract_strided_slice %231 {offsets = [8, 16], sizes = [8, 16], strides = [1, 1]} : vector<16x32xf32> to vector<8x16xf32>
    %cst_122 = arith.constant dense<0.000000e+00> : vector<8x8xf32>
    %302 = tpu.matmul %299, %300, %cst_122 {dimension_numbers = #tpu.dot_dimension_numbers<[1], [1], [0], [0], [0, 0, 1, 0], [], []>} : vector<8x16xf32>, vector<8x16xf32>, vector<8x8xf32> -> vector<8x8xf32>
    %cst_123 = arith.constant 2.500000e-01 : f32
    %303 = vector.broadcast %cst_123 : f32 to vector<8x8xf32>
    %304 = arith.mulf %302, %303 : vector<8x8xf32>
    %305 = vector.broadcast %276 : vector<1x8xf32> to vector<8x8xf32>
    %306 = arith.addf %304, %305 : vector<8x8xf32>
    %cst_124 = arith.constant dense<0xFF800000> : vector<8xf32>
    %307 = vector.multi_reduction <maximumf>, %306, %cst_124 [1] : vector<8x8xf32> to vector<8xf32>
    %308 = vector.shape_cast %307 : vector<8xf32> to vector<8x1xf32>
    %309 = vector.broadcast %308 : vector<8x1xf32> to vector<8x8xf32>
    %310 = arith.subf %306, %309 : vector<8x8xf32>
    %311 = math.exp %310 : vector<8x8xf32>
    %cst_125 = arith.constant dense<0.000000e+00> : vector<8xf32>
    %312 = vector.multi_reduction <add>, %311, %cst_125 [1] : vector<8x8xf32> to vector<8xf32>
    %313 = vector.shape_cast %312 : vector<8xf32> to vector<8x1xf32>
    %314 = vector.broadcast %313 : vector<8x1xf32> to vector<8x8xf32>
    %315 = arith.divf %311, %314 : vector<8x8xf32>
    %cst_126 = arith.constant dense<0.000000e+00> : vector<8x16xf32>
    %316 = tpu.matmul %315, %301, %cst_126 {dimension_numbers = #tpu.dot_dimension_numbers<[1], [0], [0], [1], [0, 0, 1, 1], [], []>} : vector<8x8xf32>, vector<8x16xf32>, vector<8x16xf32> -> vector<8x16xf32>
    %317 = vector.extract_strided_slice %223 {offsets = [16, 0], sizes = [16, 32], strides = [1, 1]} : vector<32x32xf32> to vector<16x32xf32>
    %cst_127 = arith.constant dense<0.000000e+00> : vector<8x32xf32>
    %318 = tpu.matmul %316, %317, %cst_127 {dimension_numbers = #tpu.dot_dimension_numbers<[1], [0], [0], [1], [0, 0, 1, 1], [], []>} : vector<8x16xf32>, vector<16x32xf32>, vector<8x32xf32> -> vector<8x32xf32>
    %319 = arith.addf %298, %318 : vector<8x32xf32>
    %320 = tpu.concatenate %275, %319 in 0 : vector<8x32xf32>, vector<8x32xf32> -> vector<16x32xf32>
    %321 = vector.broadcast %225 : vector<1x32xf32> to vector<16x32xf32>
    %322 = arith.addf %320, %321 : vector<16x32xf32>
    %323 = arith.addf %217, %322 : vector<16x32xf32>
    %c1_128 = arith.constant 1 : index
    %c0_129 = arith.constant 0 : index
    %c0_130 = arith.constant 0 : index
    %324 = vector.load %arg9[%c1_128, %c0_129, %c0_130] : memref<2x1x32xf32, #tpu.memory_space<vmem>>, vector<1x1x32xf32>
    %325 = vector.shape_cast %324 : vector<1x1x32xf32> to vector<1x32xf32>
    %c1_131 = arith.constant 1 : index
    %c0_132 = arith.constant 0 : index
    %c0_133 = arith.constant 0 : index
    %326 = vector.load %arg10[%c1_131, %c0_132, %c0_133] : memref<2x1x32xf32, #tpu.memory_space<vmem>>, vector<1x1x32xf32>
    %327 = vector.shape_cast %326 : vector<1x1x32xf32> to vector<1x32xf32>
    %cst_134 = arith.constant dense<0.000000e+00> : vector<16xf32>
    %328 = vector.multi_reduction <add>, %323, %cst_134 [1] : vector<16x32xf32> to vector<16xf32>
    %329 = vector.shape_cast %328 : vector<16xf32> to vector<16x1xf32>
    %cst_135 = arith.constant 3.200000e+01 : f32
    %330 = vector.broadcast %cst_135 : f32 to vector<16x1xf32>
    %331 = arith.divf %329, %330 : vector<16x1xf32>
    %332 = vector.broadcast %331 : vector<16x1xf32> to vector<16x32xf32>
    %333 = arith.subf %323, %332 : vector<16x32xf32>
    %334 = vector.broadcast %331 : vector<16x1xf32> to vector<16x32xf32>
    %335 = arith.subf %323, %334 : vector<16x32xf32>
    %336 = arith.mulf %333, %335 : vector<16x32xf32>
    %cst_136 = arith.constant dense<0.000000e+00> : vector<16xf32>
    %337 = vector.multi_reduction <add>, %336, %cst_136 [1] : vector<16x32xf32> to vector<16xf32>
    %338 = vector.shape_cast %337 : vector<16xf32> to vector<16x1xf32>
    %cst_137 = arith.constant 3.200000e+01 : f32
    %339 = vector.broadcast %cst_137 : f32 to vector<16x1xf32>
    %340 = arith.divf %338, %339 : vector<16x1xf32>
    %cst_138 = arith.constant 9.99999996E-13 : f32
    %341 = vector.broadcast %cst_138 : f32 to vector<16x1xf32>
    %342 = arith.addf %340, %341 : vector<16x1xf32>
    %343 = math.rsqrt %342 : vector<16x1xf32>
    %344 = vector.broadcast %331 : vector<16x1xf32> to vector<16x32xf32>
    %345 = arith.subf %323, %344 : vector<16x32xf32>
    %346 = vector.broadcast %343 : vector<16x1xf32> to vector<16x32xf32>
    %347 = arith.mulf %345, %346 : vector<16x32xf32>
    %348 = vector.broadcast %325 : vector<1x32xf32> to vector<16x32xf32>
    %349 = arith.mulf %347, %348 : vector<16x32xf32>
    %350 = vector.broadcast %327 : vector<1x32xf32> to vector<16x32xf32>
    %351 = arith.addf %349, %350 : vector<16x32xf32>
    %c1_139 = arith.constant 1 : index
    %c0_140 = arith.constant 0 : index
    %c0_141 = arith.constant 0 : index
    %352 = vector.load %arg11[%c1_139, %c0_140, %c0_141] : memref<2x32x64xf32, #tpu.memory_space<vmem>>, vector<1x32x64xf32>
    %353 = vector.shape_cast %352 : vector<1x32x64xf32> to vector<32x64xf32>
    %cst_142 = arith.constant dense<0.000000e+00> : vector<16x64xf32>
    %354 = tpu.matmul %351, %353, %cst_142 {dimension_numbers = #tpu.dot_dimension_numbers<[1], [0], [0], [1], [0, 0, 1, 1], [], []>} : vector<16x32xf32>, vector<32x64xf32>, vector<16x64xf32> -> vector<16x64xf32>
    %c1_143 = arith.constant 1 : index
    %c0_144 = arith.constant 0 : index
    %c0_145 = arith.constant 0 : index
    %355 = vector.load %arg12[%c1_143, %c0_144, %c0_145] : memref<2x1x64xf32, #tpu.memory_space<vmem>>, vector<1x1x64xf32>
    %356 = vector.shape_cast %355 : vector<1x1x64xf32> to vector<1x64xf32>
    %357 = vector.broadcast %356 : vector<1x64xf32> to vector<16x64xf32>
    %358 = arith.addf %354, %357 : vector<16x64xf32>
    %cst_146 = arith.constant 5.000000e-01 : f32
    %359 = vector.broadcast %cst_146 : f32 to vector<16x64xf32>
    %360 = arith.mulf %359, %358 : vector<16x64xf32>
    %cst_147 = arith.constant 4.471500e-02 : f32
    %361 = vector.broadcast %cst_147 : f32 to vector<16x64xf32>
    %362 = arith.mulf %361, %358 : vector<16x64xf32>
    %363 = arith.mulf %362, %358 : vector<16x64xf32>
    %364 = arith.mulf %363, %358 : vector<16x64xf32>
    %365 = arith.addf %358, %364 : vector<16x64xf32>
    %cst_148 = arith.constant 0.797884583 : f32
    %366 = vector.broadcast %cst_148 : f32 to vector<16x64xf32>
    %367 = arith.mulf %366, %365 : vector<16x64xf32>
    %368 = math.tanh %367 : vector<16x64xf32>
    %cst_149 = arith.constant 1.000000e+00 : f32
    %369 = vector.broadcast %cst_149 : f32 to vector<16x64xf32>
    %370 = arith.addf %369, %368 : vector<16x64xf32>
    %371 = arith.mulf %360, %370 : vector<16x64xf32>
    %c1_150 = arith.constant 1 : index
    %c0_151 = arith.constant 0 : index
    %c0_152 = arith.constant 0 : index
    %372 = vector.load %arg13[%c1_150, %c0_151, %c0_152] : memref<2x64x32xf32, #tpu.memory_space<vmem>>, vector<1x64x32xf32>
    %373 = vector.shape_cast %372 : vector<1x64x32xf32> to vector<64x32xf32>
    %cst_153 = arith.constant dense<0.000000e+00> : vector<16x32xf32>
    %374 = tpu.matmul %371, %373, %cst_153 {dimension_numbers = #tpu.dot_dimension_numbers<[1], [0], [0], [1], [0, 0, 1, 1], [], []>} : vector<16x64xf32>, vector<64x32xf32>, vector<16x32xf32> -> vector<16x32xf32>
    %c1_154 = arith.constant 1 : index
    %c0_155 = arith.constant 0 : index
    %c0_156 = arith.constant 0 : index
    %375 = vector.load %arg14[%c1_154, %c0_155, %c0_156] : memref<2x1x32xf32, #tpu.memory_space<vmem>>, vector<1x1x32xf32>
    %376 = vector.shape_cast %375 : vector<1x1x32xf32> to vector<1x32xf32>
    %377 = vector.broadcast %376 : vector<1x32xf32> to vector<16x32xf32>
    %378 = arith.addf %374, %377 : vector<16x32xf32>
    %379 = arith.addf %351, %378 : vector<16x32xf32>
    %c1_157 = arith.constant 1 : index
    %c0_158 = arith.constant 0 : index
    %c0_159 = arith.constant 0 : index
    %380 = vector.load %arg15[%c1_157, %c0_158, %c0_159] : memref<2x1x32xf32, #tpu.memory_space<vmem>>, vector<1x1x32xf32>
    %381 = vector.shape_cast %380 : vector<1x1x32xf32> to vector<1x32xf32>
    %c1_160 = arith.constant 1 : index
    %c0_161 = arith.constant 0 : index
    %c0_162 = arith.constant 0 : index
    %382 = vector.load %arg16[%c1_160, %c0_161, %c0_162] : memref<2x1x32xf32, #tpu.memory_space<vmem>>, vector<1x1x32xf32>
    %383 = vector.shape_cast %382 : vector<1x1x32xf32> to vector<1x32xf32>
    %cst_163 = arith.constant dense<0.000000e+00> : vector<16xf32>
    %384 = vector.multi_reduction <add>, %379, %cst_163 [1] : vector<16x32xf32> to vector<16xf32>
    %385 = vector.shape_cast %384 : vector<16xf32> to vector<16x1xf32>
    %cst_164 = arith.constant 3.200000e+01 : f32
    %386 = vector.broadcast %cst_164 : f32 to vector<16x1xf32>
    %387 = arith.divf %385, %386 : vector<16x1xf32>
    %388 = vector.broadcast %387 : vector<16x1xf32> to vector<16x32xf32>
    %389 = arith.subf %379, %388 : vector<16x32xf32>
    %390 = vector.broadcast %387 : vector<16x1xf32> to vector<16x32xf32>
    %391 = arith.subf %379, %390 : vector<16x32xf32>
    %392 = arith.mulf %389, %391 : vector<16x32xf32>
    %cst_165 = arith.constant dense<0.000000e+00> : vector<16xf32>
    %393 = vector.multi_reduction <add>, %392, %cst_165 [1] : vector<16x32xf32> to vector<16xf32>
    %394 = vector.shape_cast %393 : vector<16xf32> to vector<16x1xf32>
    %cst_166 = arith.constant 3.200000e+01 : f32
    %395 = vector.broadcast %cst_166 : f32 to vector<16x1xf32>
    %396 = arith.divf %394, %395 : vector<16x1xf32>
    %cst_167 = arith.constant 9.99999996E-13 : f32
    %397 = vector.broadcast %cst_167 : f32 to vector<16x1xf32>
    %398 = arith.addf %396, %397 : vector<16x1xf32>
    %399 = math.rsqrt %398 : vector<16x1xf32>
    %400 = vector.broadcast %387 : vector<16x1xf32> to vector<16x32xf32>
    %401 = arith.subf %379, %400 : vector<16x32xf32>
    %402 = vector.broadcast %399 : vector<16x1xf32> to vector<16x32xf32>
    %403 = arith.mulf %401, %402 : vector<16x32xf32>
    %404 = vector.broadcast %381 : vector<1x32xf32> to vector<16x32xf32>
    %405 = arith.mulf %403, %404 : vector<16x32xf32>
    %406 = vector.broadcast %383 : vector<1x32xf32> to vector<16x32xf32>
    %407 = arith.addf %405, %406 : vector<16x32xf32>
    %c0_168 = arith.constant 0 : index
    %c0_169 = arith.constant 0 : index
    %408 = vector.load %arg17[%c0_168, %c0_169] : memref<16x32xf32, #tpu.memory_space<vmem>>, vector<16x32xf32>
    tpu.vector_store %arg17[%c0_168, %c0_169], %407 {strides = array<i32>} : memref<16x32xf32, #tpu.memory_space<vmem>>, vector<16x32xf32>,
    return
  }
  func.func @transform_0(%arg0: i32) -> (i32, i32) {
    %c0_i32 = arith.constant 0 : i32
    %c0_i32_0 = arith.constant 0 : i32
    %c0_i32_1 = arith.constant 0 : i32
    return %c0_i32, %c0_i32_0 : i32, i32
  }
  func.func @transform_1(%arg0: i32) -> (i32, i32) {
    %c0_i32 = arith.constant 0 : i32
    %c0_i32_0 = arith.constant 0 : i32
    %c0_i32_1 = arith.constant 0 : i32
    return %c0_i32, %c0_i32_0 : i32, i32
  }
  func.func @transform_2(%arg0: i32) -> (i32, i32) {
    %c0_i32 = arith.constant 0 : i32
    %c0_i32_0 = arith.constant 0 : i32
    %c0_i32_1 = arith.constant 0 : i32
    return %c0_i32, %c0_i32_0 : i32, i32
  }
  func.func @transform_3(%arg0: i32) -> (i32, i32) {
    %c0_i32 = arith.constant 0 : i32
    %c0_i32_0 = arith.constant 0 : i32
    %c0_i32_1 = arith.constant 0 : i32
    return %c0_i32, %c0_i32_0 : i32, i32
  }
  func.func @transform_4(%arg0: i32) -> (i32, i32, i32) {
    %c0_i32 = arith.constant 0 : i32
    %c0_i32_0 = arith.constant 0 : i32
    %c0_i32_1 = arith.constant 0 : i32
    %c0_i32_2 = arith.constant 0 : i32
    return %c0_i32, %c0_i32_0, %c0_i32_1 : i32, i32, i32
  }
  func.func @transform_5(%arg0: i32) -> (i32, i32, i32) {
    %c0_i32 = arith.constant 0 : i32
    %c0_i32_0 = arith.constant 0 : i32
    %c0_i32_1 = arith.constant 0 : i32
    %c0_i32_2 = arith.constant 0 : i32
    return %c0_i32, %c0_i32_0, %c0_i32_1 : i32, i32, i32
  }
  func.func @transform_6(%arg0: i32) -> (i32, i32, i32) {
    %c0_i32 = arith.constant 0 : i32
    %c0_i32_0 = arith.constant 0 : i32
    %c0_i32_1 = arith.constant 0 : i32
    %c0_i32_2 = arith.constant 0 : i32
    return %c0_i32, %c0_i32_0, %c0_i32_1 : i32, i32, i32
  }
  func.func @transform_7(%arg0: i32) -> (i32, i32, i32) {
    %c0_i32 = arith.constant 0 : i32
    %c0_i32_0 = arith.constant 0 : i32
    %c0_i32_1 = arith.constant 0 : i32
    %c0_i32_2 = arith.constant 0 : i32
    return %c0_i32, %c0_i32_0, %c0_i32_1 : i32, i32, i32
  }
  func.func @transform_8(%arg0: i32) -> (i32, i32, i32) {
    %c0_i32 = arith.constant 0 : i32
    %c0_i32_0 = arith.constant 0 : i32
    %c0_i32_1 = arith.constant 0 : i32
    %c0_i32_2 = arith.constant 0 : i32
    return %c0_i32, %c0_i32_0, %c0_i32_1 : i32, i32, i32
  }
  func.func @transform_9(%arg0: i32) -> (i32, i32, i32) {
    %c0_i32 = arith.constant 0 : i32
    %c0_i32_0 = arith.constant 0 : i32
    %c0_i32_1 = arith.constant 0 : i32
    %c0_i32_2 = arith.constant 0 : i32
    return %c0_i32, %c0_i32_0, %c0_i32_1 : i32, i32, i32
  }
  func.func @transform_10(%arg0: i32) -> (i32, i32, i32) {
    %c0_i32 = arith.constant 0 : i32
    %c0_i32_0 = arith.constant 0 : i32
    %c0_i32_1 = arith.constant 0 : i32
    %c0_i32_2 = arith.constant 0 : i32
    return %c0_i32, %c0_i32_0, %c0_i32_1 : i32, i32, i32
  }
  func.func @transform_11(%arg0: i32) -> (i32, i32, i32) {
    %c0_i32 = arith.constant 0 : i32
    %c0_i32_0 = arith.constant 0 : i32
    %c0_i32_1 = arith.constant 0 : i32
    %c0_i32_2 = arith.constant 0 : i32
    return %c0_i32, %c0_i32_0, %c0_i32_1 : i32, i32, i32
  }
  func.func @transform_12(%arg0: i32) -> (i32, i32, i32) {
    %c0_i32 = arith.constant 0 : i32
    %c0_i32_0 = arith.constant 0 : i32
    %c0_i32_1 = arith.constant 0 : i32
    %c0_i32_2 = arith.constant 0 : i32
    return %c0_i32, %c0_i32_0, %c0_i32_1 : i32, i32, i32
  }
  func.func @transform_13(%arg0: i32) -> (i32, i32, i32) {
    %c0_i32 = arith.constant 0 : i32
    %c0_i32_0 = arith.constant 0 : i32
    %c0_i32_1 = arith.constant 0 : i32
    %c0_i32_2 = arith.constant 0 : i32
    return %c0_i32, %c0_i32_0, %c0_i32_1 : i32, i32, i32
  }
  func.func @transform_14(%arg0: i32) -> (i32, i32, i32) {
    %c0_i32 = arith.constant 0 : i32
    %c0_i32_0 = arith.constant 0 : i32
    %c0_i32_1 = arith.constant 0 : i32
    %c0_i32_2 = arith.constant 0 : i32
    return %c0_i32, %c0_i32_0, %c0_i32_1 : i32, i32, i32
  }
  func.func @transform_15(%arg0: i32) -> (i32, i32, i32) {
    %c0_i32 = arith.constant 0 : i32
    %c0_i32_0 = arith.constant 0 : i32
    %c0_i32_1 = arith.constant 0 : i32
    %c0_i32_2 = arith.constant 0 : i32
    return %c0_i32, %c0_i32_0, %c0_i32_1 : i32, i32, i32
  }
  func.func @transform_16(%arg0: i32) -> (i32, i32) {
    %c0_i32 = arith.constant 0 : i32
    %c0_i32_0 = arith.constant 0 : i32
    %c0_i32_1 = arith.constant 0 : i32
    return %c0_i32, %c0_i32_0 : i32, i32
  }
}

</mosaic_0001>

<bundles_post_ra>
// kernel: feature_extractor_forward.1
= control target key start
LH: loop header
LB: loop body
LE: loop exit
PB: predicated region body
PF: predicated region fallthrough
CT: control target
= control target key end

     0   :  { %vm58_vm0 = vcmask 261120   ;;  %v3417_v36 = vmov 0.0   ;;  %vm3418_vm1 = vmmov 0   ;;  %s3420_s24 = smov 96   ;;  %s3421_s25 = smov 112   ;;  %vm202_vm2 = vcmask 130048   ;;  %s3941_s0 = inlined_call_operand.vmem [shape: f32[16,32], index: 0, kind: input, shape index: {}]   ;;  %s3942_s4 = inlined_call_operand.vmem [shape: f32[2,32,96], index: 4, kind: input, shape index: {}]   ;;  %s3943_s2 = inlined_call_operand.vmem [shape: f32[1,32], index: 2, kind: input, shape index: {}]   ;;  %s3944_s3 = inlined_call_operand.vmem [shape: f32[1,32], index: 3, kind: input, shape index: {}]   ;;  %s3945_s5 = inlined_call_operand.vmem [shape: f32[2,1,96], index: 5, kind: input, shape index: {}]   ;;  %s3946_s1 = inlined_call_operand.vmem [shape: f32[2,8], index: 1, kind: input, shape index: {}]   ;;  %s3947_s6 = inlined_call_operand.vmem [shape: f32[2,32,32], index: 6, kind: input, shape index: {}]   ;;  %s3948_s7 = inlined_call_operand.vmem [shape: f32[2,1,32], index: 7, kind: input, shape index: {}]   ;;  %s3949_s8 = inlined_call_operand.vmem [shape: f32[2,1,32], index: 8, kind: input, shape index: {}]   ;;  %s3950_s9 = inlined_call_operand.vmem [shape: f32[2,1,32], index: 9, kind: input, shape index: {}]   ;;  %s3951_s10 = inlined_call_operand.vmem [shape: f32[2,32,64], index: 10, kind: input, shape index: {}]   ;;  %s3952_s12 = inlined_call_operand.vmem [shape: f32[2,64,32], index: 12, kind: input, shape index: {}]   ;;  %s3953_s11 = inlined_call_operand.vmem [shape: f32[2,1,64], index: 11, kind: input, shape index: {}]   ;;  %s3954_s13 = inlined_call_operand.vmem [shape: f32[2,1,32], index: 13, kind: input, shape index: {}]   ;;  %s3955_s14 = inlined_call_operand.vmem [shape: f32[2,1,32], index: 14, kind: input, shape index: {}]   ;;  %s3956_s15 = inlined_call_operand.vmem [shape: f32[2,1,32], index: 15, kind: input, shape index: {}]   ;;  %s3957_s16 = inlined_call_operand.vmem [shape: f32[16,32], index: 16, kind: output, shape index: {}]  }
   0x1   :  { %3959 = sst [smem:[#allocation2_spill]] %s3941_s0  ;;  %v102_v14 = vld [vmem:[%s3942_s4] sm:$0xff]  ;;  %v103_v15 = vld [vmem:[%s3942_s4 + $0x8] sm:$0xff]  ;;  %v104_v16 = vld [vmem:[%s3942_s4 + $0x10] sm:$0xff]  ;;  %3059 = vmatprep.subr.mxu1 %v3417_v36  ;;  %3061 = vmatprep.mubr.msk.f32.mxu1 %vm3418_vm1, %v3417_v36  ;;  %v278_v45 = vlaneseq  ;;  %vm283_vm3 = vcmask 64512   ;;  %s3423_s28 = smov 48  }
   0x2   :  { %s3960_s23 = sld [smem:[#allocation2_spill]]  ;;  %v3261_v17 = vpack.c.bf16 %v103_v15, %v102_v14  ;;  %v105_v18 = vld [vmem:[%s3942_s4 + $0x18] sm:$0xff]  ;;  %v2853_v27 = vld [vmem:[%s3943_s2] ss:$0 sm:$0xff]  ;;  %vm1346_vm4 = vcmask 523264  }
   0x3   :  { %v3265_v19 = vpack.c.bf16 %v105_v18, %v104_v16  ;;  %v2854_v29 = vld [vmem:[%s3944_s3] ss:$0 sm:$0xff]  ;;  %v3569_v46 = vshrl.u32 %v278_v45, 7  ;;  %v108_v16 = vld [vmem:[%s3947_s6 + $0x8] sm:$0xff] }
   0x4   :  { %3262 = vmatprep.subr.bf16.mxu0 %v3261_v17  ;;  %v2855_v37 = vld [vmem:[%s3945_s5] ss:$0 sm:$0xff] }
   0x5   :  { %3264 = vmatpush3.bf16.msra.mxu0 %v3261_v17  ;;  %v280_v47 = vsub.s32 0, %v3569_v46  ;;  %v3575_v48 = vld [vmem:[%s3946_s1] sm:$0x3]  ;;  %s3422_s1 = smov 64  }
   0x6   :  { %3266 = vmatprep.subr.bf16.mxu0 %v3265_v19  ;;  %v107_v15 = vld [vmem:[%s3947_s6] sm:$0xff] }
   0x7   :  { %v3578_v49 = vrot.slane %v3575_v48, %v280_v47 }
   0x8   :  { %v53_v0 = vld [vmem:[%s3960_s23] sm:$0xff]  ;;  %v54_v1 = vld [vmem:[%s3960_s23 + $0x8] sm:$0xff]  ;;  %s3419_s23 = smov 80  }
   0x9   :  { %v59_v2 = vsel %vm58_vm0, %v53_v0, 0.0  ;;  %v62_v3 = vsel %vm58_vm0, %v54_v1, 0.0  ;;  %3268 = vmatpush3.bf16.msra.mxu0 %v3265_v19  ;;  %v3612_v19 = vpack.c.bf16 %v108_v16, %v107_v15 }
   0xa   :  { %60 = vadd.xlane.f32.xlu0 %v59_v2  ;;  %3054 = vmatprep.subr.mxu0 %v3417_v36 }
   0xe   :  { %63 = vadd.xlane.f32.xlu0 %v62_v3 }
  0x97   :  { %v61_v4 = vpop.xlane.xlu0 %60 }
  0x98   :  { %v66_v5 = vmul.f32 0.03125, %v61_v4 }
  0x9a   :  { %v68_v6 = vsub.f32 %v53_v0, %v66_v5 }
  0x9b   :  { %v64_v7 = vpop.xlane.xlu0 %63 }
  0x9c   :  { %v67_v8 = vmul.f32 0.03125, %v64_v7  ;;  %v70_v9 = vmul.f32 %v68_v6, %v68_v6  ;;  %v3424_v7 = vmov 0.0|0.0  }
  0x9e   :  { %v69_v10 = vsub.f32 %v54_v1, %v67_v8  ;;  %v72_v11 = vsel %vm58_vm0, %v70_v9, 0.0  ;;  %v109_v8 = vld [vmem:[%s3947_s6 + $0x10] sm:$0xff]  ;;  %v110_v9 = vld [vmem:[%s3947_s6 + $0x18] sm:$0xff] }
  0x9f   :  { %73 = vadd.xlane.f32.xlu1 %v72_v11 }
  0xa0   :  { %v71_v12 = vmul.f32 %v69_v10, %v69_v10 }
  0xa2   :  { %v75_v13 = vsel %vm58_vm0, %v71_v12, 0.0 }
  0xa3   :  { %76 = vadd.xlane.f32.xlu1 %v75_v13 }
 0x12c   :  { %v74_v20 = vpop.xlane.xlu1 %73 }
 0x12d   :  { %v78_v21 = vmul.f32 0.03125, %v74_v20 }
 0x12f   :  { %v80_v22 = vadd.f32 1e-12, %v78_v21 }
 0x130   :  { %v77_v23 = vpop.xlane.xlu1 %76 }
 0x131   :  { %3357 = vrsqrt.f32 %v80_v22  ;;  %v79_v24 = vmul.f32 0.03125, %v77_v23 }
 0x133   :  { %v81_v25 = vadd.f32 1e-12, %v79_v24 }
 0x135   :  { %3359 = vrsqrt.f32 %v81_v25 }
 0x13b   :  { %v3358_v26 = vpop.eup %3357 }
 0x13c   :  { %v84_v28 = vmul.f32 %v3358_v26, %v68_v6 }
 0x13e   :  { %v92_v30 = vmul.f32 %v2853_v27, %v84_v28 }
 0x13f   :  { %v3360_v31 = vpop.eup %3359 }
 0x140   :  { %v85_v32 = vmul.f32 %v3360_v31, %v69_v10  ;;  %v3538_v33 = vadd.f32 %v2854_v29, %v92_v30  ;;  %v3270_v10 = vpack.c.bf16 %v110_v9, %v109_v8  ;;  %v764_v30 = vsub.s32 1, %v3569_v46 }
 0x142   :  { %v93_v34 = vmul.f32 %v2853_v27, %v85_v32  ;;  %3051 = vmatprep.mubr.msk.f32.mxu0 %vm58_vm0, %v3538_v33 }
 0x144   :  { %v3542_v35 = vadd.f32 %v2854_v29, %v93_v34 }
 0x146   :  { %3052 = vmatmul.mubr.msk.f32.vlgmr.msra.gmra.mrb[0].mxu0 %vm58_vm0, %v3542_v35 }
 0x147   :  { %3056 = vmatprep.mubr.msk.f32.mxu0 %vm3418_vm1, %v3417_v36 }
 0x219   :  { %v3053_v38 = vpop.f32.mrb[0].mxu0 }
 0x21a   :  { %v3555_v39 = vadd.f32 %v3053_v38, %v2855_v37  ;;  %v190_v40 = vpop.f32.mrb[1].mxu0 }
 0x21b   :  { %v191_v41 = vadd.f32 %v2855_v37, %v190_v40  ;;  %v3639_v37 = vrot.slane %v3575_v48, %v764_v30  ;;  %v2874_v48 = vld [vmem:[%s3948_s7] ss:$0 sm:$0xff] }
 0x21d   :  { %373 = vrot.lane.b32.xlu1 %v191_v41, %s3419_s23  ;;  %200 = vrot.lane.b32.xlu0 %v191_v41, %s3420_s24 }
 0x221   :  { %371 = vrot.lane.b32.xlu1 %v191_v41, %s3421_s25 }
 0x28f   :  { %v201_v42 = vpop.permute.xlu0 %200  ;;  %v374_v43 = vpop.permute.xlu1 %373 }
 0x290   :  { %3055 = vmatpush3.xpose.msk.msra.mxu0 %vm202_vm2, %v201_v42 }
 0x291   :  { %3064 = vmatprep.subr.mxu0 %v3417_v36 }
 0x293   :  { %3057 = vmatmul.mubr.msk.f32.vlgmr.msra.gmra.mrb[2].mxu0 %vm202_vm2, %v191_v41  ;;  %v372_v44 = vpop.permute.xlu1 %371 }
 0x294   :  { %3065 = vmatpush3.xpose.msk.msra.mxu0 %vm202_vm2, %v374_v43  ;;  %3066 = vmatprep.mubr.msk.f32.mxu0 %vm3418_vm1, %v3417_v36 }
 0x295   :  { %3269 = vmatprep.subr.bf16.mxu0 %v3424_v7 }
 0x297   :  { %3067 = vmatmul.mubr.msk.f32.vlgmr.msra.gmra.mrb[4].mxu0 %vm202_vm2, %v372_v44 }
 0x298   :  { %3078 = vmatprep.mubr.msk.f32.mxu0 %vm3418_vm1, %v3417_v36  ;;  %3271 = vmatpush3.bf16.msra.mxu0 %v3270_v10 }
 0x299   :  { %3088 = vmatprep.subr.mxu0 %v3417_v36 }
 0x366   :  { %v273_v50 = vpop.f32.mrb[2].mxu0 }
 0x367   :  { %v277_v51 = vmul.f32 0.25, %v273_v50  ;;  %v3058_v52 = vpop.f32.mrb[3].mxu0 }
 0x369   :  { %v282_v53 = vadd.f32 %v3578_v49, %v277_v51 }
 0x36a   :  { %v445_v54 = vpop.f32.mrb[4].mxu0 }
 0x36b   :  { %v449_v55 = vmul.f32 0.25, %v445_v54  ;;  %v3068_v56 = vpop.f32.mrb[5].mxu0  ;;  %v284_v57 = vsel %vm283_vm3, %v282_v53, -inf }
 0x36c   :  { %285 = vmax.xlane.f32.xlu1 %v284_v57 }
 0x36d   :  { %v450_v58 = vadd.f32 %v449_v55, %v3578_v49 }
 0x36f   :  { %v451_v59 = vsel %vm283_vm3, %v450_v58, -inf }
 0x370   :  { %452 = vmax.xlane.f32.xlu0 %v451_v59 }
 0x37d   :  { %295 = vrot.lane.b32.xlu1 %v191_v41, %s3422_s1 }
 0x381   :  { %685 = vrot.lane.b32.xlu1 %v3555_v39, %s3420_s24 }
 0x385   :  { %856 = vrot.lane.b32.xlu1 %v3555_v39, %s3419_s23 }
 0x389   :  { %854 = vrot.lane.b32.xlu1 %v3555_v39, %s3421_s25 }
 0x3f9   :  { %v286_v60 = vpop.xlane.xlu1 %285 }
 0x3fa   :  { %v287_v61 = vsub.f32 %v282_v53, %v286_v60 }
 0x3fc   :  { %v288_v62 = vmul.f32 1.442695, %v287_v61 }
 0x3fd   :  { %v296_v63 = vpop.permute.xlu1 %295  ;;  %v453_v0 = vpop.xlane.xlu0 %452 }
 0x3fe   :  { %3361 = vpow2.f32 %v288_v62  ;;  %v454_v1 = vsub.f32 %v450_v58, %v453_v0  ;;  %3060 = vmatpush3.msra.mxu1 %v296_v63 }
 0x3ff   :  { %3069 = vmatprep.subr.mxu1 %v3417_v36 }
 0x400   :  { %v455_v2 = vmul.f32 1.442695, %v454_v1 }
 0x401   :  { %v686_v21 = vpop.permute.xlu1 %685 }
 0x402   :  { %3363 = vpow2.f32 %v455_v2 }
 0x405   :  { %v857_v26 = vpop.permute.xlu1 %856 }
 0x408   :  { %v3362_v3 = vpop.eup %3361 }
 0x409   :  { %v290_v4 = vsel %vm283_vm3, %v3362_v3, 0.0  ;;  %v855_v27 = vpop.permute.xlu1 %854 }
 0x40a   :  { %291 = vadd.xlane.f32.xlu0 %v290_v4 }
 0x40c   :  { %v3364_v5 = vpop.eup %3363 }
 0x40d   :  { %v457_v6 = vsel %vm283_vm3, %v3364_v5, 0.0 }
 0x40e   :  { %458 = vadd.xlane.f32.xlu0 %v457_v6 }
 0x424   :  { %462 = vrot.lane.b32.xlu0 %v191_v41, %s3423_s28 }
 0x497   :  { %v292_v11 = vpop.xlane.xlu0 %291 }
 0x498   :  { %3365 = vrcp.f32 %v292_v11 }
 0x49b   :  { %v459_v12 = vpop.xlane.xlu0 %458 }
 0x49c   :  { %3367 = vrcp.f32 %v459_v12 }
 0x49f   :  { %v463_v17 = vpop.permute.xlu0 %462 }
 0x4a2   :  { %v3366_v13 = vpop.eup %3365 }
 0x4a3   :  { %v294_v14 = vmul.f32 %v3366_v13, %v3362_v3 }
 0x4a5   :  { %3062 = vmatmul.mubr.msk.f32.vlgmr.msra.gmra.mrb[0].mxu1 %vm283_vm3, %v294_v14 }
 0x4a6   :  { %v3368_v18 = vpop.eup %3367  ;;  %3070 = vmatpush3.msra.mxu1 %v463_v17  ;;  %3071 = vmatprep.mubr.msk.f32.mxu1 %vm3418_vm1, %v3417_v36 }
 0x4a7   :  { %v461_v20 = vmul.f32 %v3368_v18, %v3364_v5  ;;  %3272 = vmatprep.subr.bf16.mxu1 %v3424_v7 }
 0x4a9   :  { %3072 = vmatmul.mubr.msk.f32.vlgmr.msra.gmra.mrb[2].mxu1 %vm283_vm3, %v461_v20 }
 0x4aa   :  { %3274 = vmatpush3.bf16.msra.mxu1 %v3612_v19  ;;  %3085 = vmatprep.mubr.msk.f32.mxu1 %vm3418_vm1, %v3417_v36 }
 0x4ab   :  { %3093 = vmatprep.subr.mxu1 %v3417_v36 }
 0x578   :  { %v367_v22 = vpop.f32.mrb[0].mxu1 }
 0x579   :  { %v3063_v23 = vpop.f32.mrb[1].mxu1  ;;  %3086 = vmatmul.mubr.msk.f32.vlgmr.msra.gmra.mrb[4].mxu1 %vm202_vm2, %v367_v22 }
 0x57a   :  { %3095 = vmatprep.mubr.msk.f32.mxu1 %vm3418_vm1, %v3417_v36 }
 0x57c   :  { %v534_v24 = vpop.f32.mrb[2].mxu1 }
 0x57d   :  { %v3073_v25 = vpop.f32.mrb[3].mxu1  ;;  %3079 = vmatmul.mubr.msk.f32.vlgmr.msra.gmra.mrb[6].mxu0 %vm202_vm2, %v534_v24 }
 0x57e   :  { %3089 = vmatpush3.xpose.msk.msra.mxu0 %vm202_vm2, %v686_v21  ;;  %3090 = vmatprep.mubr.msk.f32.mxu0 %vm3418_vm1, %v3417_v36 }
 0x57f   :  { %3098 = vmatprep.subr.mxu0 %v3417_v36 }
 0x581   :  { %3091 = vmatmul.mubr.msk.f32.vlgmr.msra.gmra.mrb[8].mxu0 %vm202_vm2, %v3555_v39 }
 0x582   :  { %3099 = vmatpush3.xpose.msk.msra.mxu0 %vm202_vm2, %v857_v26  ;;  %3100 = vmatprep.mubr.msk.f32.mxu0 %vm3418_vm1, %v3417_v36 }
 0x583   :  { %3275 = vmatprep.subr.bf16.mxu0 %v3424_v7 }
 0x585   :  { %3101 = vmatmul.mubr.msk.f32.vlgmr.msra.gmra.mrb[10].mxu0 %vm202_vm2, %v855_v27 }
 0x586   :  { %3277 = vmatpush3.bf16.msra.mxu0 %v3270_v10  ;;  %3112 = vmatprep.mubr.msk.f32.mxu0 %vm3418_vm1, %v3417_v36 }
 0x64c   :  { %v680_v28 = vpop.f32.mrb[4].mxu1 }
 0x64d   :  { %v3087_v29 = vpop.f32.mrb[5].mxu1 }
 0x650   :  { %v607_v31 = vpop.f32.mrb[6].mxu0 }
 0x651   :  { %v681_v32 = vadd.f32 %v680_v28, %v607_v31  ;;  %v3080_v34 = vpop.f32.mrb[7].mxu0 }
 0x653   :  { %v1173_v51 = vadd.f32 %v2874_v48, %v681_v32 }
 0x654   :  { %v757_v38 = vpop.f32.mrb[8].mxu0 }
 0x655   :  { %v761_v40 = vmul.f32 0.25, %v757_v38  ;;  %v3092_v41 = vpop.f32.mrb[9].mxu0  ;;  %v1175_v52 = vadd.f32 %v1173_v51, %v3538_v33  ;;  %v2876_v38 = vld [vmem:[%s3950_s9] ss:$0 sm:$0xff] }
 0x657   :  { %v766_v42 = vadd.f32 %v3639_v37, %v761_v40  ;;  %v1179_v53 = vsel %vm58_vm0, %v1175_v52, 0.0 }
 0x658   :  { %v928_v43 = vpop.f32.mrb[10].mxu0 }
 0x659   :  { %v932_v44 = vmul.f32 0.25, %v928_v43  ;;  %v3102_v45 = vpop.f32.mrb[11].mxu0  ;;  %v767_v47 = vsel %vm283_vm3, %v766_v42, -inf  ;;  %v1222_v43 = vld [vmem:[%s3951_s10 + $0x8] sm:$0xff] }
 0x65a   :  { %768 = vmax.xlane.f32.xlu0 %v767_v47  ;;  %v1223_v45 = vld [vmem:[%s3951_s10 + $0x10] sm:$0xff]  ;;  %v1224_v47 = vld [vmem:[%s3951_s10 + $0x18] sm:$0xff] }
 0x65b   :  { %v933_v50 = vadd.f32 %v932_v44, %v3639_v37 }
 0x65d   :  { %v934_v46 = vsel %vm283_vm3, %v933_v50, -inf }
 0x65e   :  { %935 = vmax.xlane.f32.xlu1 %v934_v46 }
 0x66f   :  { %945 = vrot.lane.b32.xlu1 %v3555_v39, %s3423_s28 }
 0x693   :  { %1180 = vadd.xlane.f32.xlu1 %v1179_v53 }
 0x6e7   :  { %v769_v54 = vpop.xlane.xlu0 %768 }
 0x6e8   :  { %v770_v55 = vsub.f32 %v766_v42, %v769_v54  ;;  %v1221_v42 = vld [vmem:[%s3951_s10] sm:$0xff] }
 0x6e9   :  { %v3281_v44 = vpack.c.bf16 %v1222_v43, %v1221_v42 }
 0x6ea   :  { %v771_v56 = vmul.f32 1.442695, %v770_v55 }
 0x6eb   :  { %v936_v57 = vpop.xlane.xlu1 %935  ;;  %3282 = vmatprep.subr.bf16.mxu0 %v3281_v44 }
 0x6ec   :  { %3369 = vpow2.f32 %v771_v56  ;;  %v937_v58 = vsub.f32 %v933_v50, %v936_v57  ;;  %v3285_v50 = vpack.c.bf16 %v1224_v47, %v1223_v45  ;;  %v1331_v56 = vld [vmem:[%s3952_s12] sm:$0xff]  ;;  %v1332_v57 = vld [vmem:[%s3952_s12 + $0x8] sm:$0xff] }
 0x6ee   :  { %v938_v59 = vmul.f32 1.442695, %v937_v58  ;;  %v3289_v58 = vpack.c.bf16 %v1332_v57, %v1331_v56 }
 0x6ef   :  { %v946_v4 = vpop.permute.xlu1 %945 }
 0x6f0   :  { %3371 = vpow2.f32 %v938_v59  ;;  %v1333_v59 = vld [vmem:[%s3952_s12 + $0x10] sm:$0xff] }
 0x6f6   :  { %v3370_v60 = vpop.eup %3369 }
 0x6f7   :  { %v773_v61 = vsel %vm283_vm3, %v3370_v60, 0.0 }
 0x6f8   :  { %774 = vadd.xlane.f32.xlu0 %v773_v61 }
 0x6fa   :  { %v3372_v62 = vpop.eup %3371 }
 0x6fb   :  { %v940_v63 = vsel %vm283_vm3, %v3372_v62, 0.0 }
 0x6fc   :  { %941 = vadd.xlane.f32.xlu0 %v940_v63  ;;  %v1336_v63 = vld [vmem:[%s3952_s12 + $0x28] sm:$0xff] }
 0x712   :  { %778 = vrot.lane.b32.xlu0 %v3555_v39, %s3422_s1 }
 0x720   :  { %v1181_v11 = vpop.xlane.xlu1 %1180 }
 0x721   :  { %v1185_v14 = vmul.f32 0.03125, %v1181_v11 }
 0x723   :  { %v1187_v18 = vsub.f32 %v1175_v52, %v1185_v14 }
 0x725   :  { %v1189_v22 = vmul.f32 %v1187_v18, %v1187_v18 }
 0x727   :  { %v1191_v23 = vsel %vm58_vm0, %v1189_v22, 0.0 }
 0x785   :  { %v775_v33 = vpop.xlane.xlu0 %774 }
 0x786   :  { %3373 = vrcp.f32 %v775_v33 }
 0x789   :  { %v942_v0 = vpop.xlane.xlu0 %941 }
 0x78a   :  { %3375 = vrcp.f32 %v942_v0  ;;  %v1337_v0 = vld [vmem:[%s3952_s12 + $0x30] sm:$0xff] }
 0x78d   :  { %v779_v1 = vpop.permute.xlu0 %778 }
 0x78e   :  { %3094 = vmatpush3.msra.mxu1 %v779_v1  ;;  %v1338_v1 = vld [vmem:[%s3952_s12 + $0x38] sm:$0xff] }
 0x78f   :  { %3103 = vmatprep.subr.mxu1 %v3417_v36 }
 0x790   :  { %v3374_v2 = vpop.eup %3373 }
 0x791   :  { %v777_v3 = vmul.f32 %v3374_v2, %v3370_v60  ;;  %v1334_v60 = vld [vmem:[%s3952_s12 + $0x18] sm:$0xff]  ;;  %v3301_v2 = vpack.c.bf16 %v1338_v1, %v1337_v0 }
 0x792   :  { %v3293_v61 = vpack.c.bf16 %v1334_v60, %v1333_v59 }
 0x793   :  { %3096 = vmatmul.mubr.msk.f32.vlgmr.msra.gmra.mrb[6].mxu1 %vm283_vm3, %v777_v3  ;;  %v2877_v3 = vld [vmem:[%s3953_s11] ss:$0 sm:$0xff] }
 0x794   :  { %v3376_v5 = vpop.eup %3375  ;;  %3104 = vmatpush3.msra.mxu1 %v946_v4  ;;  %3105 = vmatprep.mubr.msk.f32.mxu1 %vm3418_vm1, %v3417_v36 }
 0x795   :  { %v944_v6 = vmul.f32 %v3376_v5, %v3372_v62  ;;  %3278 = vmatprep.subr.bf16.mxu1 %v3424_v7  ;;  %v1335_v62 = vld [vmem:[%s3952_s12 + $0x20] sm:$0xff] }
 0x796   :  { %v3297_v33 = vpack.c.bf16 %v1336_v63, %v1335_v62  ;;  %v2883_v63 = vld [vmem:[%s3955_s14] ss:$0 sm:$0xff] }
 0x797   :  { %3106 = vmatmul.mubr.msk.f32.vlgmr.msra.gmra.mrb[8].mxu1 %vm283_vm3, %v944_v6 }
 0x798   :  { %3280 = vmatpush3.bf16.msra.mxu1 %v3612_v19  ;;  %3119 = vmatprep.mubr.msk.f32.mxu1 %vm3418_vm1, %v3417_v36 }
 0x799   :  { %3290 = vmatprep.subr.bf16.mxu1 %v3289_v58 }
 0x866   :  { %v850_v39 = vpop.f32.mrb[6].mxu1 }
 0x867   :  { %v3097_v8 = vpop.f32.mrb[7].mxu1  ;;  %3120 = vmatmul.mubr.msk.f32.vlgmr.msra.gmra.mrb[10].mxu1 %vm202_vm2, %v850_v39 }
 0x868   :  { %3292 = vmatpush3.bf16.msra.mxu1 %v3289_v58 }
 0x869   :  { %3294 = vmatprep.subr.bf16.mxu1 %v3293_v61 }
 0x86a   :  { %v1017_v9 = vpop.f32.mrb[8].mxu1 }
 0x86b   :  { %v3107_v10 = vpop.f32.mrb[9].mxu1  ;;  %3113 = vmatmul.mubr.msk.f32.vlgmr.msra.gmra.mrb[12].mxu0 %vm202_vm2, %v1017_v9 }
 0x86c   :  { %3284 = vmatpush3.bf16.msra.mxu0 %v3281_v44  ;;  %3296 = vmatpush3.bf16.msra.mxu1 %v3293_v61 }
 0x86d   :  { %3286 = vmatprep.subr.bf16.mxu0 %v3285_v50  ;;  %3298 = vmatprep.subr.bf16.mxu1 %v3297_v33 }
 0x870   :  { %3288 = vmatpush3.bf16.msra.mxu0 %v3285_v50  ;;  %3300 = vmatpush3.bf16.msra.mxu1 %v3297_v33 }
 0x871   :  { %3302 = vmatprep.subr.bf16.mxu1 %v3301_v2 }
 0x874   :  { %3304 = vmatpush3.bf16.msra.mxu1 %v3301_v2  ;;  %v2884_v2 = vld [vmem:[%s3956_s15] ss:$0 sm:$0xff] }
 0x875   :  { %3168 = vmatprep.subr.mxu1 %v3417_v36 }
 0x93a   :  { %v1163_v12 = vpop.f32.mrb[10].mxu1 }
 0x93b   :  { %v3121_v13 = vpop.f32.mrb[11].mxu1 }
 0x93e   :  { %v1090_v15 = vpop.f32.mrb[12].mxu0 }
 0x93f   :  { %v1164_v16 = vadd.f32 %v1163_v12, %v1090_v15  ;;  %v3114_v17 = vpop.f32.mrb[13].mxu0 }
 0x941   :  { %v1174_v19 = vadd.f32 %v2874_v48, %v1164_v16 }
 0x943   :  { %v1176_v20 = vadd.f32 %v1174_v19, %v3542_v35  ;;  %v2875_v35 = vld [vmem:[%s3949_s8] ss:$0 sm:$0xff] }
 0x945   :  { %v1182_v21 = vsel %vm58_vm0, %v1176_v20, 0.0 }
 0x946   :  { %1183 = vadd.xlane.f32.xlu0 %v1182_v21 }
 0x94a   :  { %1192 = vadd.xlane.f32.xlu0 %v1191_v23 }
 0x9d3   :  { %v1184_v24 = vpop.xlane.xlu0 %1183 }
 0x9d4   :  { %v1186_v25 = vmul.f32 0.03125, %v1184_v24 }
 0x9d6   :  { %v1188_v26 = vsub.f32 %v1176_v20, %v1186_v25 }
 0x9d7   :  { %v1193_v27 = vpop.xlane.xlu0 %1192 }
 0x9d8   :  { %v1197_v28 = vmul.f32 0.03125, %v1193_v27  ;;  %v1190_v29 = vmul.f32 %v1188_v26, %v1188_v26 }
 0x9da   :  { %v1199_v30 = vadd.f32 1e-12, %v1197_v28  ;;  %v1194_v31 = vsel %vm58_vm0, %v1190_v29, 0.0 }
 0x9db   :  { %1195 = vadd.xlane.f32.xlu1 %v1194_v31 }
 0x9dc   :  { %3377 = vrsqrt.f32 %v1199_v30 }
 0x9e6   :  { %v3378_v32 = vpop.eup %3377 }
 0x9e7   :  { %v1203_v34 = vmul.f32 %v3378_v32, %v1187_v18 }
 0x9e9   :  { %v1211_v40 = vmul.f32 %v2875_v35, %v1203_v34 }
 0x9eb   :  { %v3677_v41 = vadd.f32 %v2876_v38, %v1211_v40 }
 0x9ed   :  { %3130 = vmatprep.mubr.msk.f32.mxu0 %vm58_vm0, %v3677_v41 }
 0xa68   :  { %v1196_v46 = vpop.xlane.xlu1 %1195 }
 0xa69   :  { %v1198_v48 = vmul.f32 0.03125, %v1196_v46 }
 0xa6b   :  { %v1200_v51 = vadd.f32 1e-12, %v1198_v48 }
 0xa6d   :  { %3379 = vrsqrt.f32 %v1200_v51  ;;  %v2886_v51 = vld [vmem:[%s3942_s4 + $0x28] sm:$0xff] }
 0xa77   :  { %v3380_v52 = vpop.eup %3379 }
 0xa78   :  { %v1204_v53 = vmul.f32 %v3380_v52, %v1188_v26  ;;  %v2880_v26 = vld [vmem:[%s3954_s13] ss:$0 sm:$0xff] }
 0xa7a   :  { %v1212_v54 = vmul.f32 %v2875_v35, %v1204_v53  ;;  %v2887_v53 = vld [vmem:[%s3942_s4 + $0x30] sm:$0xff] }
 0xa7c   :  { %v1220_v55 = vadd.f32 %v2876_v38, %v1212_v54  ;;  %v2888_v54 = vld [vmem:[%s3942_s4 + $0x38] sm:$0xff] }
 0xa7e   :  { %3131 = vmatmul.mubr.msk.f32.vlgmr.msra.gmra.mrb[14].mxu0 %vm58_vm0, %v1220_v55 }
 0xb51   :  { %v3132_v4 = vpop.f32.mrb[14].mxu0 }
 0xb52   :  { %v1310_v5 = vadd.f32 %v3132_v4, %v2877_v3  ;;  %v1304_v6 = vpop.f32.mrb[15].mxu0 }
 0xb53   :  { %v1305_v39 = vadd.f32 %v2877_v3, %v1304_v6 }
 0xb54   :  { %v1316_v8 = vmul.f32 0.044715, %v1310_v5  ;;  %v1314_v23 = vmul.f32 0.5, %v1310_v5 }
 0xb55   :  { %v1315_v9 = vmul.f32 0.044715, %v1305_v39  ;;  %v1313_v21 = vmul.f32 0.5, %v1305_v39 }
 0xb56   :  { %v1318_v10 = vmul.f32 %v1316_v8, %v1310_v5 }
 0xb57   :  { %v1317_v11 = vmul.f32 %v1315_v9, %v1305_v39 }
 0xb58   :  { %v1320_v12 = vmul.f32 %v1318_v10, %v1310_v5 }
 0xb59   :  { %v1319_v13 = vmul.f32 %v1317_v11, %v1305_v39 }
 0xb5a   :  { %v1322_v14 = vadd.f32 %v1320_v12, %v1310_v5 }
 0xb5b   :  { %v1321_v15 = vadd.f32 %v1319_v13, %v1305_v39  ;;  %v2895_v39 = vld [vmem:[%s3945_s5 + $0x1] ss:$0 sm:$0xff] }
 0xb5c   :  { %v1324_v16 = vmul.f32 0.7978846, %v1322_v14 }
 0xb5d   :  { %v1323_v17 = vmul.f32 0.7978846, %v1321_v15 }
 0xb5e   :  { %3381 = vtanh.f32 %v1324_v16 }
 0xb5f   :  { %3383 = vtanh.f32 %v1323_v17 }
 0xb68   :  { %v3382_v18 = vpop.eup %3381 }
 0xb69   :  { %v3384_v19 = vpop.eup %3383  ;;  %v1328_v20 = vadd.f32 1.0, %v3382_v18 }
 0xb6a   :  { %v1327_v22 = vadd.f32 1.0, %v3384_v19 }
 0xb6b   :  { %v1330_v25 = vmul.f32 %v1328_v20, %v1314_v23 }
 0xb6c   :  { %v1329_v24 = vmul.f32 %v1327_v22, %v1313_v21 }
 0xb6e   :  { %3149 = vmatprep.mubr.msk.f32.mxu1 %vm1346_vm4, %v1329_v24 }
 0xb6f   :  { %3150 = vmatmul.mubr.msk.f32.vlgmr.msra.gmra.mrb[12].mxu1 %vm1346_vm4, %v1330_v25 }
 0xb70   :  { %3170 = vmatprep.mubr.msk.f32.mxu1 %vm3418_vm1, %v3417_v36 }
 0xc42   :  { %v3151_v27 = vpop.f32.mrb[12].mxu1 }
 0xc43   :  { %v1425_v28 = vadd.f32 %v3151_v27, %v2880_v26  ;;  %v1419_v29 = vpop.f32.mrb[13].mxu1 }
 0xc44   :  { %v1420_v30 = vadd.f32 %v2880_v26, %v1419_v29 }
 0xc45   :  { %v1429_v31 = vadd.f32 %v1425_v28, %v1220_v55  ;;  %v3309_v55 = vpack.c.bf16 %v2888_v54, %v2887_v53 }
 0xc46   :  { %v1428_v32 = vadd.f32 %v1420_v30, %v3677_v41  ;;  %v2885_v41 = vld [vmem:[%s3942_s4 + $0x20] sm:$0xff] }
 0xc47   :  { %v1435_v35 = vsel %vm58_vm0, %v1429_v31, 0.0  ;;  %v3305_v52 = vpack.c.bf16 %v2886_v51, %v2885_v41 }
 0xc48   :  { %1436 = vadd.xlane.f32.xlu1 %v1435_v35  ;;  %v1432_v34 = vsel %vm58_vm0, %v1428_v32, 0.0 }
 0xc49   :  { %1433 = vadd.xlane.f32.xlu0 %v1432_v34  ;;  %3306 = vmatprep.subr.bf16.mxu0 %v3305_v52 }
 0xc4a   :  { %3308 = vmatpush3.bf16.msra.mxu0 %v3305_v52 }
 0xc4b   :  { %3310 = vmatprep.subr.bf16.mxu0 %v3309_v55 }
 0xc4e   :  { %3312 = vmatpush3.bf16.msra.mxu0 %v3309_v55 }
 0xc4f   :  { %3163 = vmatprep.subr.mxu0 %v3417_v36 }
 0xcd5   :  { %v1437_v38 = vpop.xlane.xlu1 %1436 }
 0xcd6   :  { %v1439_v40 = vmul.f32 0.03125, %v1437_v38  ;;  %v1434_v42 = vpop.xlane.xlu0 %1433  ;;  %v2892_v38 = vld [vmem:[%s3947_s6 + $0x30] sm:$0xff] }
 0xcd7   :  { %v1438_v43 = vmul.f32 0.03125, %v1434_v42 }
 0xcd8   :  { %v1441_v44 = vsub.f32 %v1429_v31, %v1439_v40  ;;  %v2893_v40 = vld [vmem:[%s3947_s6 + $0x38] sm:$0xff] }
 0xcd9   :  { %v1440_v45 = vsub.f32 %v1428_v32, %v1438_v43  ;;  %v3314_v42 = vpack.c.bf16 %v2893_v40, %v2892_v38 }
 0xcda   :  { %v1443_v47 = vmul.f32 %v1441_v44, %v1441_v44 }
 0xcdb   :  { %v1442_v50 = vmul.f32 %v1440_v45, %v1440_v45 }
 0xcdc   :  { %v1447_v46 = vsel %vm58_vm0, %v1443_v47, 0.0 }
 0xcdd   :  { %1448 = vadd.xlane.f32.xlu1 %v1447_v46  ;;  %v1444_v48 = vsel %vm58_vm0, %v1442_v50, 0.0  ;;  %v2890_v50 = vld [vmem:[%s3947_s6 + $0x20] sm:$0xff]  ;;  %v2891_v46 = vld [vmem:[%s3947_s6 + $0x28] sm:$0xff] }
 0xcde   :  { %1445 = vadd.xlane.f32.xlu0 %v1444_v48  ;;  %v3812_v51 = vpack.c.bf16 %v2891_v46, %v2890_v50 }
 0xd6a   :  { %v1449_v56 = vpop.xlane.xlu1 %1448 }
 0xd6b   :  { %v1451_v57 = vmul.f32 0.03125, %v1449_v56  ;;  %v1446_v58 = vpop.xlane.xlu0 %1445 }
 0xd6c   :  { %v1450_v59 = vmul.f32 0.03125, %v1446_v58 }
 0xd6d   :  { %v1453_v60 = vadd.f32 1e-12, %v1451_v57 }
 0xd6e   :  { %v1452_v61 = vadd.f32 1e-12, %v1450_v59 }
 0xd6f   :  { %3385 = vrsqrt.f32 %v1453_v60 }
 0xd70   :  { %3387 = vrsqrt.f32 %v1452_v61 }
 0xd79   :  { %v3386_v62 = vpop.eup %3385 }
 0xd7a   :  { %v3388_v33 = vpop.eup %3387  ;;  %v1457_v0 = vmul.f32 %v3386_v62, %v1441_v44 }
 0xd7b   :  { %v1456_v1 = vmul.f32 %v3388_v33, %v1440_v45 }
 0xd7c   :  { %v1465_v3 = vmul.f32 %v2883_v63, %v1457_v0 }
 0xd7d   :  { %v1464_v4 = vmul.f32 %v2883_v63, %v1456_v1 }
 0xd7e   :  { %v3755_v6 = vadd.f32 %v2884_v2, %v1465_v3 }
 0xd7f   :  { %v3753_v5 = vadd.f32 %v2884_v2, %v1464_v4 }
 0xd81   :  { %3160 = vmatprep.mubr.msk.f32.mxu0 %vm58_vm0, %v3753_v5 }
 0xd82   :  { %3161 = vmatmul.mubr.msk.f32.vlgmr.msra.gmra.mrb[16].mxu0 %vm58_vm0, %v3755_v6 }
 0xd83   :  { %3165 = vmatprep.mubr.msk.f32.mxu0 %vm3418_vm1, %v3417_v36 }
 0xe55   :  { %v3162_v8 = vpop.f32.mrb[16].mxu0 }
 0xe56   :  { %v3766_v9 = vadd.f32 %v3162_v8, %v2895_v39  ;;  %v1566_v10 = vpop.f32.mrb[17].mxu0 }
 0xe57   :  { %v1567_v11 = vadd.f32 %v2895_v39, %v1566_v10 }
 0xe59   :  { %1743 = vrot.lane.b32.xlu1 %v1567_v11, %s3419_s23  ;;  %1576 = vrot.lane.b32.xlu0 %v1567_v11, %s3420_s24 }
 0xe5d   :  { %1741 = vrot.lane.b32.xlu1 %v1567_v11, %s3421_s25 }
 0xecb   :  { %v1577_v12 = vpop.permute.xlu0 %1576  ;;  %v1744_v13 = vpop.permute.xlu1 %1743 }
 0xecc   :  { %3164 = vmatpush3.xpose.msk.msra.mxu0 %vm202_vm2, %v1577_v12 }
 0xecd   :  { %3173 = vmatprep.subr.mxu0 %v3417_v36 }
 0xecf   :  { %3166 = vmatmul.mubr.msk.f32.vlgmr.msra.gmra.mrb[18].mxu0 %vm202_vm2, %v1567_v11  ;;  %v1742_v14 = vpop.permute.xlu1 %1741 }
 0xed0   :  { %3174 = vmatpush3.xpose.msk.msra.mxu0 %vm202_vm2, %v1744_v13  ;;  %3175 = vmatprep.mubr.msk.f32.mxu0 %vm3418_vm1, %v3417_v36  ;;  %v2914_v13 = vld [vmem:[%s3948_s7 + $0x1] ss:$0 sm:$0xff] }
 0xed1   :  { %3313 = vmatprep.subr.bf16.mxu0 %v3424_v7 }
 0xed3   :  { %3176 = vmatmul.mubr.msk.f32.vlgmr.msra.gmra.mrb[20].mxu0 %vm202_vm2, %v1742_v14 }
 0xed4   :  { %3187 = vmatprep.mubr.msk.f32.mxu0 %vm3418_vm1, %v3417_v36  ;;  %3315 = vmatpush3.bf16.msra.mxu0 %v3314_v42 }
 0xed5   :  { %3197 = vmatprep.subr.mxu0 %v3417_v36 }
 0xfa2   :  { %v1648_v15 = vpop.f32.mrb[18].mxu0 }
 0xfa3   :  { %v1652_v16 = vmul.f32 0.25, %v1648_v15  ;;  %v3167_v17 = vpop.f32.mrb[19].mxu0 }
 0xfa5   :  { %v1653_v18 = vadd.f32 %v1652_v16, %v3578_v49 }
 0xfa6   :  { %v1815_v19 = vpop.f32.mrb[20].mxu0 }
 0xfa7   :  { %v1819_v20 = vmul.f32 0.25, %v1815_v19  ;;  %v3177_v21 = vpop.f32.mrb[21].mxu0  ;;  %v1654_v22 = vsel %vm283_vm3, %v1653_v18, -inf }
 0xfa8   :  { %1655 = vmax.xlane.f32.xlu1 %v1654_v22 }
 0xfa9   :  { %v1820_v23 = vadd.f32 %v1819_v20, %v3578_v49 }
 0xfab   :  { %v1821_v24 = vsel %vm283_vm3, %v1820_v23, -inf }
 0xfac   :  { %1822 = vmax.xlane.f32.xlu0 %v1821_v24 }
 0xfb9   :  { %1665 = vrot.lane.b32.xlu1 %v1567_v11, %s3422_s1 }
 0xfbd   :  { %2055 = vrot.lane.b32.xlu1 %v3766_v9, %s3420_s24 }
 0xfc1   :  { %2222 = vrot.lane.b32.xlu1 %v3766_v9, %s3419_s23 }
 0xfc5   :  { %2220 = vrot.lane.b32.xlu1 %v3766_v9, %s3421_s25 }
0x1035   :  { %v1656_v25 = vpop.xlane.xlu1 %1655 }
0x1036   :  { %v1657_v26 = vsub.f32 %v1653_v18, %v1656_v25 }
0x1038   :  { %v1658_v27 = vmul.f32 1.442695, %v1657_v26 }
0x1039   :  { %v1666_v28 = vpop.permute.xlu1 %1665  ;;  %v1823_v29 = vpop.xlane.xlu0 %1822 }
0x103a   :  { %3389 = vpow2.f32 %v1658_v27  ;;  %v1824_v49 = vsub.f32 %v1820_v23, %v1823_v29  ;;  %3169 = vmatpush3.msra.mxu1 %v1666_v28 }
0x103b   :  { %3178 = vmatprep.subr.mxu1 %v3417_v36 }
0x103c   :  { %v1825_v30 = vmul.f32 1.442695, %v1824_v49 }
0x103d   :  { %v2056_v53 = vpop.permute.xlu1 %2055 }
0x103e   :  { %3391 = vpow2.f32 %v1825_v30 }
0x1041   :  { %v2223_v58 = vpop.permute.xlu1 %2222 }
0x1044   :  { %v3390_v31 = vpop.eup %3389 }
0x1045   :  { %v1660_v32 = vsel %vm283_vm3, %v3390_v31, 0.0  ;;  %v2221_v59 = vpop.permute.xlu1 %2220 }
0x1046   :  { %1661 = vadd.xlane.f32.xlu0 %v1660_v32 }
0x1048   :  { %v3392_v35 = vpop.eup %3391 }
0x1049   :  { %v1827_v34 = vsel %vm283_vm3, %v3392_v35, 0.0 }
0x104a   :  { %1828 = vadd.xlane.f32.xlu0 %v1827_v34 }
0x1060   :  { %1832 = vrot.lane.b32.xlu0 %v1567_v11, %s3423_s28 }
0x10d3   :  { %v1662_v43 = vpop.xlane.xlu0 %1661 }
0x10d4   :  { %3393 = vrcp.f32 %v1662_v43 }
0x10d7   :  { %v1829_v44 = vpop.xlane.xlu0 %1828 }
0x10d8   :  { %3395 = vrcp.f32 %v1829_v44 }
0x10db   :  { %v1833_v48 = vpop.permute.xlu0 %1832 }
0x10de   :  { %v3394_v45 = vpop.eup %3393 }
0x10df   :  { %v1664_v47 = vmul.f32 %v3394_v45, %v3390_v31 }
0x10e1   :  { %3171 = vmatmul.mubr.msk.f32.vlgmr.msra.gmra.mrb[14].mxu1 %vm283_vm3, %v1664_v47 }
0x10e2   :  { %v3396_v41 = vpop.eup %3395  ;;  %3179 = vmatpush3.msra.mxu1 %v1833_v48  ;;  %3180 = vmatprep.mubr.msk.f32.mxu1 %vm3418_vm1, %v3417_v36 }
0x10e3   :  { %v1831_v52 = vmul.f32 %v3396_v41, %v3392_v35  ;;  %3316 = vmatprep.subr.bf16.mxu1 %v3424_v7 }
0x10e5   :  { %3181 = vmatmul.mubr.msk.f32.vlgmr.msra.gmra.mrb[16].mxu1 %vm283_vm3, %v1831_v52 }
0x10e6   :  { %3318 = vmatpush3.bf16.msra.mxu1 %v3812_v51  ;;  %3194 = vmatprep.mubr.msk.f32.mxu1 %vm3418_vm1, %v3417_v36 }
0x10e7   :  { %3202 = vmatprep.subr.mxu1 %v3417_v36 }
0x11b4   :  { %v1737_v54 = vpop.f32.mrb[14].mxu1 }
0x11b5   :  { %v3172_v55 = vpop.f32.mrb[15].mxu1  ;;  %3195 = vmatmul.mubr.msk.f32.vlgmr.msra.gmra.mrb[18].mxu1 %vm202_vm2, %v1737_v54 }
0x11b6   :  { %3204 = vmatprep.mubr.msk.f32.mxu1 %vm3418_vm1, %v3417_v36 }
0x11b8   :  { %v1904_v56 = vpop.f32.mrb[16].mxu1 }
0x11b9   :  { %v3182_v57 = vpop.f32.mrb[17].mxu1  ;;  %3188 = vmatmul.mubr.msk.f32.vlgmr.msra.gmra.mrb[22].mxu0 %vm202_vm2, %v1904_v56 }
0x11ba   :  { %3198 = vmatpush3.xpose.msk.msra.mxu0 %vm202_vm2, %v2056_v53  ;;  %3199 = vmatprep.mubr.msk.f32.mxu0 %vm3418_vm1, %v3417_v36 }
0x11bb   :  { %3207 = vmatprep.subr.mxu0 %v3417_v36 }
0x11bd   :  { %3200 = vmatmul.mubr.msk.f32.vlgmr.msra.gmra.mrb[24].mxu0 %vm202_vm2, %v3766_v9 }
0x11be   :  { %3208 = vmatpush3.xpose.msk.msra.mxu0 %vm202_vm2, %v2223_v58  ;;  %3209 = vmatprep.mubr.msk.f32.mxu0 %vm3418_vm1, %v3417_v36 }
0x11bf   :  { %3319 = vmatprep.subr.bf16.mxu0 %v3424_v7 }
0x11c1   :  { %3210 = vmatmul.mubr.msk.f32.vlgmr.msra.gmra.mrb[26].mxu0 %vm202_vm2, %v2221_v59 }
0x11c2   :  { %3321 = vmatpush3.bf16.msra.mxu0 %v3314_v42  ;;  %3221 = vmatprep.mubr.msk.f32.mxu0 %vm3418_vm1, %v3417_v36 }
0x1288   :  { %v2050_v60 = vpop.f32.mrb[18].mxu1 }
0x1289   :  { %v3196_v61 = vpop.f32.mrb[19].mxu1 }
0x128a   :  { %v2918_v61 = vld [vmem:[%s3950_s9 + $0x1] ss:$0 sm:$0xff] }
0x128c   :  { %v1977_v62 = vpop.f32.mrb[22].mxu0 }
0x128d   :  { %v2051_v63 = vadd.f32 %v2050_v60, %v1977_v62  ;;  %v3189_v33 = vpop.f32.mrb[23].mxu0 }
0x128e   :  { %v2919_v33 = vld [vmem:[%s3951_s10 + $0x20] sm:$0xff] }
0x128f   :  { %v2539_v14 = vadd.f32 %v2914_v13, %v2051_v63 }
0x1290   :  { %v2127_v0 = vpop.f32.mrb[24].mxu0 }
0x1291   :  { %v2131_v1 = vmul.f32 0.25, %v2127_v0  ;;  %v3201_v2 = vpop.f32.mrb[25].mxu0  ;;  %v2541_v15 = vadd.f32 %v2539_v14, %v3753_v5  ;;  %v2920_v0 = vld [vmem:[%s3951_s10 + $0x28] sm:$0xff] }
0x1292   :  { %v2921_v2 = vld [vmem:[%s3951_s10 + $0x30] sm:$0xff] }
0x1293   :  { %v2132_v3 = vadd.f32 %v2131_v1, %v3639_v37  ;;  %v2547_v16 = vsel %vm58_vm0, %v2541_v15, 0.0  ;;  %v3325_v1 = vpack.c.bf16 %v2920_v0, %v2919_v33 }
0x1294   :  { %v2294_v4 = vpop.f32.mrb[26].mxu0 }
0x1295   :  { %v2298_v39 = vmul.f32 0.25, %v2294_v4  ;;  %v3211_v8 = vpop.f32.mrb[27].mxu0  ;;  %v2133_v10 = vsel %vm283_vm3, %v2132_v3, -inf  ;;  %3326 = vmatprep.subr.bf16.mxu0 %v3325_v1 }
0x1296   :  { %2134 = vmax.xlane.f32.xlu0 %v2133_v10 }
0x1297   :  { %v2299_v11 = vadd.f32 %v2298_v39, %v3639_v37 }
0x1299   :  { %v2300_v12 = vsel %vm283_vm3, %v2299_v11, -inf }
0x129a   :  { %2301 = vmax.xlane.f32.xlu1 %v2300_v12 }
0x12ab   :  { %2311 = vrot.lane.b32.xlu1 %v3766_v9, %s3423_s28 }
0x12cf   :  { %2548 = vadd.xlane.f32.xlu1 %v2547_v16  ;;  %v2928_v16 = vld [vmem:[%s3952_s12 + $0x48] sm:$0xff] }
0x1323   :  { %v2135_v17 = vpop.xlane.xlu0 %2134 }
0x1324   :  { %v2136_v18 = vsub.f32 %v2132_v3, %v2135_v17  ;;  %v2922_v3 = vld [vmem:[%s3951_s10 + $0x38] sm:$0xff] }
0x1325   :  { %v3329_v4 = vpack.c.bf16 %v2922_v3, %v2921_v2 }
0x1326   :  { %v2137_v19 = vmul.f32 1.442695, %v2136_v18  ;;  %v2929_v18 = vld [vmem:[%s3952_s12 + $0x50] sm:$0xff] }
0x1327   :  { %v2302_v37 = vpop.xlane.xlu1 %2301 }
0x1328   :  { %3397 = vpow2.f32 %v2137_v19  ;;  %v2303_v20 = vsub.f32 %v2299_v11, %v2302_v37  ;;  %v2930_v19 = vld [vmem:[%s3952_s12 + $0x58] sm:$0xff] }
0x1329   :  { %v3337_v37 = vpack.c.bf16 %v2930_v19, %v2929_v18 }
0x132a   :  { %v2304_v21 = vmul.f32 1.442695, %v2303_v20  ;;  %v2931_v20 = vld [vmem:[%s3952_s12 + $0x60] sm:$0xff] }
0x132b   :  { %v2312_v49 = vpop.permute.xlu1 %2311 }
0x132c   :  { %3399 = vpow2.f32 %v2304_v21  ;;  %v2932_v21 = vld [vmem:[%s3952_s12 + $0x68] sm:$0xff] }
0x1332   :  { %v3398_v22 = vpop.eup %3397 }
0x1333   :  { %v2139_v23 = vsel %vm283_vm3, %v3398_v22, 0.0 }
0x1334   :  { %2140 = vadd.xlane.f32.xlu0 %v2139_v23  ;;  %v2933_v23 = vld [vmem:[%s3952_s12 + $0x70] sm:$0xff] }
0x1336   :  { %v3400_v24 = vpop.eup %3399 }
0x1337   :  { %v2306_v25 = vsel %vm283_vm3, %v3400_v24, 0.0 }
0x1338   :  { %2307 = vadd.xlane.f32.xlu0 %v2306_v25 }
0x134e   :  { %2144 = vrot.lane.b32.xlu0 %v3766_v9, %s3422_s1 }
0x135c   :  { %v2549_v38 = vpop.xlane.xlu1 %2548 }
0x135d   :  { %v2553_v43 = vmul.f32 0.03125, %v2549_v38 }
0x135f   :  { %v2555_v47 = vsub.f32 %v2541_v15, %v2553_v43  ;;  %v2927_v15 = vld [vmem:[%s3952_s12 + $0x40] sm:$0xff] }
0x1360   :  { %v3333_v17 = vpack.c.bf16 %v2928_v16, %v2927_v15  ;;  %v2942_v15 = vld [vmem:[%s3956_s15 + $0x1] ss:$0 sm:$0xff] }
0x1361   :  { %v2557_v48 = vmul.f32 %v2555_v47, %v2555_v47 }
0x1363   :  { %v2559_v41 = vsel %vm58_vm0, %v2557_v48, 0.0  ;;  %v2936_v48 = vld [vmem:[%s3954_s13 + $0x1] ss:$0 sm:$0xff] }
0x13c1   :  { %v2141_v5 = vpop.xlane.xlu0 %2140 }
0x13c2   :  { %3401 = vrcp.f32 %v2141_v5  ;;  %v2924_v5 = vld [vmem:[%s3953_s11 + $0x1] ss:$0 sm:$0xff] }
0x13c5   :  { %v2308_v26 = vpop.xlane.xlu0 %2307 }
0x13c6   :  { %3403 = vrcp.f32 %v2308_v26 }
0x13c9   :  { %v2145_v27 = vpop.permute.xlu0 %2144 }
0x13ca   :  { %3203 = vmatpush3.msra.mxu1 %v2145_v27 }
0x13cb   :  { %3212 = vmatprep.subr.mxu1 %v3417_v36 }
0x13cc   :  { %v3402_v28 = vpop.eup %3401 }
0x13cd   :  { %v2143_v29 = vmul.f32 %v3402_v28, %v3398_v22  ;;  %v3341_v22 = vpack.c.bf16 %v2932_v21, %v2931_v20 }
0x13cf   :  { %3205 = vmatmul.mubr.msk.f32.vlgmr.msra.gmra.mrb[20].mxu1 %vm283_vm3, %v2143_v29 }
0x13d0   :  { %v3404_v30 = vpop.eup %3403  ;;  %3213 = vmatpush3.msra.mxu1 %v2312_v49  ;;  %3214 = vmatprep.mubr.msk.f32.mxu1 %vm3418_vm1, %v3417_v36 }
0x13d1   :  { %v2310_v31 = vmul.f32 %v3404_v30, %v3400_v24  ;;  %3322 = vmatprep.subr.bf16.mxu1 %v3424_v7  ;;  %v2934_v24 = vld [vmem:[%s3952_s12 + $0x78] sm:$0xff] }
0x13d2   :  { %v3345_v25 = vpack.c.bf16 %v2934_v24, %v2933_v23 }
0x13d3   :  { %3215 = vmatmul.mubr.msk.f32.vlgmr.msra.gmra.mrb[22].mxu1 %vm283_vm3, %v2310_v31 }
0x13d4   :  { %3324 = vmatpush3.bf16.msra.mxu1 %v3812_v51  ;;  %3228 = vmatprep.mubr.msk.f32.mxu1 %vm3418_vm1, %v3417_v36 }
0x13d5   :  { %3334 = vmatprep.subr.bf16.mxu1 %v3333_v17 }
0x14a2   :  { %v2216_v9 = vpop.f32.mrb[20].mxu1 }
0x14a3   :  { %v3206_v32 = vpop.f32.mrb[21].mxu1  ;;  %3229 = vmatmul.mubr.msk.f32.vlgmr.msra.gmra.mrb[24].mxu1 %vm202_vm2, %v2216_v9 }
0x14a4   :  { %3336 = vmatpush3.bf16.msra.mxu1 %v3333_v17 }
0x14a5   :  { %3338 = vmatprep.subr.bf16.mxu1 %v3337_v37 }
0x14a6   :  { %v2383_v35 = vpop.f32.mrb[22].mxu1 }
0x14a7   :  { %v3216_v34 = vpop.f32.mrb[23].mxu1  ;;  %3222 = vmatmul.mubr.msk.f32.vlgmr.msra.gmra.mrb[28].mxu0 %vm202_vm2, %v2383_v35 }
0x14a8   :  { %3328 = vmatpush3.bf16.msra.mxu0 %v3325_v1  ;;  %3340 = vmatpush3.bf16.msra.mxu1 %v3337_v37 }
0x14a9   :  { %3330 = vmatprep.subr.bf16.mxu0 %v3329_v4  ;;  %3342 = vmatprep.subr.bf16.mxu1 %v3341_v22 }
0x14ac   :  { %3332 = vmatpush3.bf16.msra.mxu0 %v3329_v4  ;;  %3344 = vmatpush3.bf16.msra.mxu1 %v3341_v22 }
0x14ad   :  { %3346 = vmatprep.subr.bf16.mxu1 %v3345_v25 }
0x14b0   :  { %3348 = vmatpush3.bf16.msra.mxu1 %v3345_v25 }
0x1576   :  { %v2529_v40 = vpop.f32.mrb[24].mxu1 }
0x1577   :  { %v3230_v42 = vpop.f32.mrb[25].mxu1 }
0x157a   :  { %v2456_v7 = vpop.f32.mrb[28].mxu0 }
0x157b   :  { %v2530_v44 = vadd.f32 %v2529_v40, %v2456_v7  ;;  %v3223_v45 = vpop.f32.mrb[29].mxu0 }
0x157d   :  { %v2540_v50 = vadd.f32 %v2914_v13, %v2530_v44 }
0x157f   :  { %v2542_v46 = vadd.f32 %v2540_v50, %v3755_v6  ;;  %v2917_v6 = vld [vmem:[%s3949_s8 + $0x1] ss:$0 sm:$0xff] }
0x1581   :  { %v2550_v36 = vsel %vm58_vm0, %v2542_v46, 0.0 }
0x1582   :  { %2551 = vadd.xlane.f32.xlu0 %v2550_v36 }
0x1586   :  { %2560 = vadd.xlane.f32.xlu0 %v2559_v41 }
0x160f   :  { %v2552_v51 = vpop.xlane.xlu0 %2551 }
0x1610   :  { %v2554_v52 = vmul.f32 0.03125, %v2552_v51 }
0x1612   :  { %v2556_v53 = vsub.f32 %v2542_v46, %v2554_v52 }
0x1613   :  { %v2561_v54 = vpop.xlane.xlu0 %2560 }
0x1614   :  { %v2565_v55 = vmul.f32 0.03125, %v2561_v54  ;;  %v2558_v56 = vmul.f32 %v2556_v53, %v2556_v53 }
0x1616   :  { %v2567_v57 = vadd.f32 1e-12, %v2565_v55  ;;  %v2562_v58 = vsel %vm58_vm0, %v2558_v56, 0.0 }
0x1617   :  { %2563 = vadd.xlane.f32.xlu1 %v2562_v58 }
0x1618   :  { %3405 = vrsqrt.f32 %v2567_v57 }
0x1622   :  { %v3406_v59 = vpop.eup %3405 }
0x1623   :  { %v2571_v60 = vmul.f32 %v3406_v59, %v2555_v47 }
0x1625   :  { %v2579_v62 = vmul.f32 %v2917_v6, %v2571_v60 }
0x1627   :  { %v3873_v63 = vadd.f32 %v2918_v61, %v2579_v62 }
0x1629   :  { %3239 = vmatprep.mubr.msk.f32.mxu0 %vm58_vm0, %v3873_v63 }
0x16a4   :  { %v2564_v39 = vpop.xlane.xlu1 %2563 }
0x16a5   :  { %v2566_v8 = vmul.f32 0.03125, %v2564_v39 }
0x16a7   :  { %v2568_v10 = vadd.f32 1e-12, %v2566_v8 }
0x16a9   :  { %3407 = vrsqrt.f32 %v2568_v10 }
0x16b3   :  { %v3408_v11 = vpop.eup %3407 }
0x16b4   :  { %v2572_v12 = vmul.f32 %v3408_v11, %v2556_v53 }
0x16b6   :  { %v2580_v13 = vmul.f32 %v2917_v6, %v2572_v12  ;;  %v2941_v12 = vld [vmem:[%s3955_s14 + $0x1] ss:$0 sm:$0xff] }
0x16b8   :  { %v2588_v14 = vadd.f32 %v2918_v61, %v2580_v13 }
0x16ba   :  { %3240 = vmatmul.mubr.msk.f32.vlgmr.msra.gmra.mrb[30].mxu0 %vm58_vm0, %v2588_v14 }
0x178d   :  { %v3241_v26 = vpop.f32.mrb[30].mxu0 }
0x178e   :  { %v2680_v27 = vadd.f32 %v3241_v26, %v2924_v5  ;;  %v2674_v28 = vpop.f32.mrb[31].mxu0 }
0x178f   :  { %v2675_v29 = vadd.f32 %v2924_v5, %v2674_v28 }
0x1790   :  { %v2686_v49 = vmul.f32 0.044715, %v2680_v27  ;;  %v2684_v50 = vmul.f32 0.5, %v2680_v27 }
0x1791   :  { %v2685_v30 = vmul.f32 0.044715, %v2675_v29  ;;  %v2683_v45 = vmul.f32 0.5, %v2675_v29 }
0x1792   :  { %v2688_v31 = vmul.f32 %v2686_v49, %v2680_v27 }
0x1793   :  { %v2687_v9 = vmul.f32 %v2685_v30, %v2675_v29 }
0x1794   :  { %v2690_v32 = vmul.f32 %v2688_v31, %v2680_v27 }
0x1795   :  { %v2689_v35 = vmul.f32 %v2687_v9, %v2675_v29 }
0x1796   :  { %v2692_v34 = vadd.f32 %v2690_v32, %v2680_v27 }
0x1797   :  { %v2691_v38 = vadd.f32 %v2689_v35, %v2675_v29 }
0x1798   :  { %v2694_v40 = vmul.f32 0.7978846, %v2692_v34 }
0x1799   :  { %v2693_v42 = vmul.f32 0.7978846, %v2691_v38 }
0x179a   :  { %3409 = vtanh.f32 %v2694_v40 }
0x179b   :  { %3411 = vtanh.f32 %v2693_v42 }
0x17a4   :  { %v3410_v43 = vpop.eup %3409 }
0x17a5   :  { %v3412_v7 = vpop.eup %3411  ;;  %v2698_v44 = vadd.f32 1.0, %v3410_v43 }
0x17a6   :  { %v2697_v47 = vadd.f32 1.0, %v3412_v7 }
0x17a7   :  { %v2700_v36 = vmul.f32 %v2698_v44, %v2684_v50 }
0x17a8   :  { %v2699_v46 = vmul.f32 %v2697_v47, %v2683_v45 }
0x17aa   :  { %3258 = vmatprep.mubr.msk.f32.mxu1 %vm1346_vm4, %v2699_v46 }
0x17ab   :  { %3259 = vmatmul.mubr.msk.f32.vlgmr.msra.gmra.mrb[26].mxu1 %vm1346_vm4, %v2700_v36 }
0x187e   :  { %v3260_v41 = vpop.f32.mrb[26].mxu1 }
0x187f   :  { %v2796_v51 = vadd.f32 %v3260_v41, %v2936_v48  ;;  %v2790_v52 = vpop.f32.mrb[27].mxu1 }
0x1880   :  { %v2791_v53 = vadd.f32 %v2936_v48, %v2790_v52 }
0x1881   :  { %v2800_v54 = vadd.f32 %v2796_v51, %v2588_v14 }
0x1882   :  { %v2799_v55 = vadd.f32 %v2791_v53, %v3873_v63 }
0x1883   :  { %v2808_v56 = vsel %vm58_vm0, %v2800_v54, 0.0 }
0x1884   :  { %2809 = vadd.xlane.f32.xlu1 %v2808_v56  ;;  %v2805_v57 = vsel %vm58_vm0, %v2799_v55, 0.0 }
0x1885   :  { %2806 = vadd.xlane.f32.xlu0 %v2805_v57 }
0x1911   :  { %v2810_v58 = vpop.xlane.xlu1 %2809 }
0x1912   :  { %v2812_v59 = vmul.f32 0.03125, %v2810_v58  ;;  %v2807_v6 = vpop.xlane.xlu0 %2806 }
0x1913   :  { %v2811_v60 = vmul.f32 0.03125, %v2807_v6 }
0x1914   :  { %v2814_v61 = vsub.f32 %v2800_v54, %v2812_v59 }
0x1915   :  { %v2813_v62 = vsub.f32 %v2799_v55, %v2811_v60 }
0x1916   :  { %v2816_v33 = vmul.f32 %v2814_v61, %v2814_v61 }
0x1917   :  { %v2815_v0 = vmul.f32 %v2813_v62, %v2813_v62 }
0x1918   :  { %v2820_v1 = vsel %vm58_vm0, %v2816_v33, 0.0 }
0x1919   :  { %2821 = vadd.xlane.f32.xlu1 %v2820_v1  ;;  %v2817_v2 = vsel %vm58_vm0, %v2815_v0, 0.0 }
0x191a   :  { %2818 = vadd.xlane.f32.xlu0 %v2817_v2 }
0x19a6   :  { %v2822_v63 = vpop.xlane.xlu1 %2821 }
0x19a7   :  { %v2824_v3 = vmul.f32 0.03125, %v2822_v63  ;;  %v2819_v4 = vpop.xlane.xlu0 %2818 }
0x19a8   :  { %v2823_v39 = vmul.f32 0.03125, %v2819_v4 }
0x19a9   :  { %v2826_v8 = vadd.f32 1e-12, %v2824_v3 }
0x19aa   :  { %v2825_v10 = vadd.f32 1e-12, %v2823_v39 }
0x19ab   :  { %3413 = vrsqrt.f32 %v2826_v8 }
0x19ac   :  { %3415 = vrsqrt.f32 %v2825_v10 }
0x19b5   :  { %v3414_v11 = vpop.eup %3413 }
0x19b6   :  { %v3416_v13 = vpop.eup %3415  ;;  %v2830_v14 = vmul.f32 %v3414_v11, %v2814_v61 }
0x19b7   :  { %v2829_v16 = vmul.f32 %v3416_v13, %v2813_v62 }
0x19b8   :  { %v2838_v17 = vmul.f32 %v2941_v12, %v2830_v14 }
0x19b9   :  { %v2837_v18 = vmul.f32 %v2941_v12, %v2829_v16 }
0x19ba   :  { %v2846_v19 = vadd.f32 %v2942_v15, %v2838_v17 }
0x19bb   :  { %v2845_v37 = vadd.f32 %v2942_v15, %v2837_v18 }
0x19bc   :  { %2848 = vst.msk [vmem:[%s3957_s16 + $0x8] sm:$0xff] %vm58_vm0, %v2846_v19 }
0x19bd   :  { %2847 = vst.msk [vmem:[%s3957_s16] sm:$0xff] %vm58_vm0, %v2845_v37 }

</bundles_post_ra>
